<compile_context>
chip_gen: v6e
topology: v6e:2x2x1
jax: 0.10.0
libtpu: 0.0.40
codegen_flags: <defaults>
</compile_context>

<pallas_src>
import functools
import math

import jax
import jax.numpy as jnp
from jax import lax
from jax.experimental import pallas as pl
from jax.experimental.pallas import tpu as pltpu

# ----------------------------- config ---------------------------------------
N_FEA_IN = 4            # conv1 input channels (= img channels + 1 mean channel)
N_FEA_MID = 40          # n_fea_middle (RetinexFormer default)
N_FEA_OUT = 3
IMG_C = N_FEA_IN - 1    # raw image channels
KSIZE = 5               # depth_conv kernel size
PAD = KSIZE // 2


# ----------------------------- fused Pallas kernel ---------------------------

def _illum_kernel(band_ref, cmask_ref, w1_ref, wd_ref, bd_ref, w2_ref, b2_ref,
                  fea_ref, map_ref, stack_ref, *, W, cmid, tile_n, band_len):
    """One (batch, row-band) tile; everything is [C, flat-pixels] lane-dense.

    band_ref : (1, 1, 4, band_len)  image band + ones "bias gate" channel,
                                    with a 2-row halo (zeros outside the image)
    cmask_ref: (KSIZE, band_len)    horizontal zero-padding masks (one per dj)
    w1_ref   : (cmid, 4)   f32      conv1 (mean folded into cols 0..2, bias col 3)
    wd_ref   : (cmid, 25*cmid) bf16 depth-conv block-diagonal weights, tap-major
    bd_ref   : (cmid, 1)   f32      depth-conv bias
    w2_ref   : (3, cmid)   f32      conv2 weights
    b2_ref   : (3, 1)      f32      conv2 bias
    fea_ref  : (1, cmid, tile_n)    illu_fea output tile
    map_ref  : (1, 3, tile_n)       illu_map output tile
    stack_ref: (25*cmid, tile_n) f32 scratch holding the 25 stacked taps
    """
    band = band_ref[0, 0]                                         # (4, band_len)

    # conv1 (1x1).  Mean channel + bias are folded into w1 host-side; the ones
    # channel of `band` is zero outside the image, so x1 is exactly zero in the
    # vertical halo (matching depth_conv's zero padding).  K=4 -> keep f32.
    x1 = jnp.dot(w1_ref[...], band,
                 preferred_element_type=jnp.float32)               # (cmid, band_len)

    # depth_conv (5x5, pad=2, groups=4): build all 25 taps into one stacked
    # buffer, then do a single K=25*cmid MXU matmul.  Output pixel n (local
    # row*W+col) needs x1_band[n + di*W + (dj-PAD)], so:
    #   - horizontal offset dj-PAD: one lane roll + column mask per dj (4 rolls,
    #     4 mask multiplies; dj==PAD needs neither),
    #   - vertical offset di: a further roll by di*W (never wraps for the kept
    #     first tile_n lanes), no mask needed (halo rows of x1 are real or zero).
    for dj in range(KSIZE):
        if dj == PAD:
            xh = x1
        else:
            xh = pltpu.roll(x1, shift=(PAD - dj) % band_len, axis=1)
            xh = xh * cmask_ref[dj:dj + 1, :]        # zero the horizontal halo
        for di in range(KSIZE):
            tap = xh if di == 0 else pltpu.roll(
                xh, shift=(-di * W) % band_len, axis=1)
            r = (di * KSIZE + dj) * cmid
            stack_ref[r:r + cmid, :] = tap[:, :tile_n]

    # One big matmul, bf16 operands, f32 accumulate.
    # TODO(synk): if profiling shows the MXU still binding, split into 4
    # group-permuted (gsize, 25*gsize) contractions to skip the structural zeros.
    fea = (jnp.dot(wd_ref[...], stack_ref[...].astype(jnp.bfloat16),
                   preferred_element_type=jnp.float32)
           + bd_ref[...])                                          # (cmid, tile_n)
    fea_ref[0] = fea

    # conv2 (1x1 + bias), fused epilogue (tiny: M=3, kept f32 for accuracy).
    map_ref[0] = (jnp.dot(w2_ref[...], fea, preferred_element_type=jnp.float32)
                  + b2_ref[...])


# ----------------------------- wrapper ---------------------------------------

def _pick_tile_h(H, W, cmid):
    """Pick a row-band height: tile_h*W a multiple of 128 lanes, stacked-tap
    scratch (25*cmid*tile_h*W*4 bytes) <= ~6 MiB, and at least 1024 lanes when
    possible so the MXU N-dim stays busy."""
    divisors = [th for th in range(1, H + 1) if H % th == 0]
    ok = [th for th in divisors
          if (th * W) % 128 == 0
          and KSIZE * KSIZE * cmid * th * W * 4 <= (6 << 20)]
    if not ok:
        # TODO(synk): support a ragged last band instead of one band per image
        # for awkward H/W (only hit for shapes where no divisor is lane-aligned).
        return H
    for th in ok:
        if th * W >= 1024:
            return th
    return ok[0]


def illumination_estimator(img, p, tile_h=None):
    """img: [B, 3, H, W] float32 (NCHW).  Returns (illu_fea [B,Cmid,H,W],
    illu_map [B,3,H,W]) exactly like the PyTorch module."""
    B, C, H, W = img.shape
    assert C == IMG_C
    cmid = p['w1'].shape[0]
    if tile_h is None:
        tile_h = _pick_tile_h(H, W, cmid)
    n_th = H // tile_h
    tile_n = tile_h * W

    # Band geometry: tile rows + 2-row halo top/bottom, rounded up so the
    # flattened band length is a multiple of 128 lanes (vreg-aligned rolls).
    band_rows = tile_h + 2 * PAD
    lane_quant = 128 // math.gcd(W, 128)
    band_rows = ((band_rows + lane_quant - 1) // lane_quant) * lane_quant
    band_len = band_rows * W
    pad_bottom = band_rows - tile_h - PAD            # >= PAD

    imgf = img.astype(jnp.float32)
    ones = jnp.ones((B, 1, H, W), jnp.float32)       # conv1-bias gate channel
    x = jnp.concatenate([imgf, ones], axis=1)        # [B, 4, H, W]
    x = jnp.pad(x, ((0, 0), (0, 0), (PAD, pad_bottom), (0, 0)))
    # Overlapping row-bands with halo (standard Blocked BlockSpecs can't express
    # overlapping windows; duplicating only the 4 small input channels is cheap).
    bands = jnp.stack(
        [lax.slice_in_dim(x, t * tile_h, t * tile_h + band_rows, axis=2)
         for t in range(n_th)], axis=1)              # [B, n_th, 4, band_rows, W]
    bands = bands.reshape(B, n_th, IMG_C + 1, band_len)

    # Horizontal zero-padding masks, one per kernel column offset dj (precomputed
    # host-side; the dj==PAD mask is all-ones and skipped in the kernel).
    col = jnp.arange(band_len, dtype=jnp.int32) % W
    dj = jnp.arange(KSIZE, dtype=jnp.int32)[:, None]
    cmask = ((col[None, :] + dj - PAD >= 0)
             & (col[None, :] + dj - PAD < W)).astype(jnp.float32)   # (5, band_len)

    nstack = KSIZE * KSIZE * cmid
    kernel = functools.partial(_illum_kernel, W=W, cmid=cmid,
                               tile_n=tile_n, band_len=band_len)

    fea, imap = pl.pallas_call(
        kernel,
        out_shape=(jax.ShapeDtypeStruct((B, cmid, H * W), jnp.float32),
                   jax.ShapeDtypeStruct((B, N_FEA_OUT, H * W), jnp.float32)),
        grid=(B, n_th),
        in_specs=[
            pl.BlockSpec((1, 1, IMG_C + 1, band_len), lambda b, t: (b, t, 0, 0)),
            pl.BlockSpec((KSIZE, band_len), lambda b, t: (0, 0)),
            pl.BlockSpec((cmid, IMG_C + 1), lambda b, t: (0, 0)),
            pl.BlockSpec((cmid, nstack), lambda b, t: (0, 0)),
            pl.BlockSpec((cmid, 1), lambda b, t: (0, 0)),
            pl.BlockSpec((N_FEA_OUT, cmid), lambda b, t: (0, 0)),
            pl.BlockSpec((N_FEA_OUT, 1), lambda b, t: (0, 0)),
        ],
        out_specs=(
            pl.BlockSpec((1, cmid, tile_n), lambda b, t: (b, 0, t)),
            pl.BlockSpec((1, N_FEA_OUT, tile_n), lambda b, t: (b, 0, t)),
        ),
        scratch_shapes=[pltpu.VMEM((nstack, tile_n), jnp.float32)],
        compiler_params=pltpu.CompilerParams(
            dimension_semantics=("parallel", "parallel"),
            vmem_limit_bytes=32 * 1024 * 1024),
    )(bands, cmask, p['w1'], p['wd'], p['bd'], p['w2'], p['b2'])

    return fea.reshape(B, cmid, H, W), imap.reshape(B, N_FEA_OUT, H, W)


# ----------------------------- parameters ------------------------------------

def build_raw_params(key, cmid=N_FEA_MID):
    """Parameters in PyTorch layout (deterministic)."""
    ks = jax.random.split(key, 6)
    gsize = cmid // N_FEA_IN
    return {
        'conv1_w': 0.2 * jax.random.normal(ks[0], (cmid, N_FEA_IN, 1, 1), jnp.float32),
        'conv1_b': 0.05 * jax.random.normal(ks[1], (cmid,), jnp.float32),
        'depth_w': 0.2 * jax.random.normal(ks[2], (cmid, gsize, KSIZE, KSIZE), jnp.float32),
        'depth_b': 0.05 * jax.random.normal(ks[3], (cmid,), jnp.float32),
        'conv2_w': 0.2 * jax.random.normal(ks[4], (N_FEA_OUT, cmid, 1, 1), jnp.float32),
        'conv2_b': 0.05 * jax.random.normal(ks[5], (N_FEA_OUT,), jnp.float32),
    }


def pack_params(raw):
    """Repack PyTorch-layout weights for the fused kernel (one-time glue)."""
    cmid = raw['conv1_w'].shape[0]
    assert cmid % N_FEA_IN == 0
    gsize = cmid // N_FEA_IN

    # conv1: fold the mean channel (cat([img, mean]) conv == 3-input conv with
    # W_eff = W[:, :3] + W[:, 3:4]/3) and put the bias into a 4th column that
    # multiplies the in-image "ones" gate channel.
    w1 = raw['conv1_w'].reshape(cmid, N_FEA_IN)
    w1e = jnp.concatenate(
        [w1[:, :IMG_C] + w1[:, IMG_C:] / IMG_C,
         raw['conv1_b'].reshape(cmid, 1)], axis=1)                 # (cmid, 4)

    # depth_conv: expand grouped [Cmid, Cmid/4, 5, 5] weights into a dense
    # block-diagonal (Cmid, 25*Cmid) matrix whose column blocks are ordered
    # tap-major (di*5+dj), matching the stacked-tap buffer built in the kernel.
    dw = raw['depth_w']                                            # (cmid, gsize, 5, 5)
    co = jnp.arange(cmid)
    ci = jnp.arange(cmid)
    group = co // gsize                                            # output-channel group
    same = (ci[None, :] // gsize) == group[:, None]                # (cmid, cmid)
    local = jnp.clip(ci[None, :] - (group * gsize)[:, None], 0, gsize - 1)
    dense = jnp.where(same[:, :, None, None],
                      dw[co[:, None], local], 0.0)                 # (out, in, 5, 5)
    wd = jnp.transpose(dense, (0, 2, 3, 1)).reshape(cmid, KSIZE * KSIZE * cmid)

    return {
        'w1': w1e.astype(jnp.float32),
        'wd': wd.astype(jnp.bfloat16),        # bf16 MXU operand (f32 accumulate)
        'bd': raw['depth_b'].reshape(cmid, 1).astype(jnp.float32),
        'w2': raw['conv2_w'].reshape(N_FEA_OUT, cmid).astype(jnp.float32),
        'b2': raw['conv2_b'].reshape(N_FEA_OUT, 1).astype(jnp.float32),
    }


# ----------------------------- plain-XLA reference ---------------------------

def reference_forward(img, raw):
    dn = ('NCHW', 'OIHW', 'NCHW')
    prec = lax.Precision.HIGHEST
    mean_c = jnp.mean(img, axis=1, keepdims=True)
    inp = jnp.concatenate([img, mean_c], axis=1)
    x1 = lax.conv_general_dilated(inp, raw['conv1_w'], (1, 1), 'VALID',
                                  dimension_numbers=dn, precision=prec)
    x1 = x1 + raw['conv1_b'][None, :, None, None]
    fea = lax.conv_general_dilated(x1, raw['depth_w'], (1, 1),
                                   ((PAD, PAD), (PAD, PAD)),
                                   dimension_numbers=dn,
                                   feature_group_count=N_FEA_IN, precision=prec)
    fea = fea + raw['depth_b'][None, :, None, None]
    imap = lax.conv_general_dilated(fea, raw['conv2_w'], (1, 1), 'VALID',
                                    dimension_numbers=dn, precision=prec)
    imap = imap + raw['conv2_b'][None, :, None, None]
    return fea, imap


# ----------------------------- main -------------------------------------------

if __name__ == "__main__":
    key = jax.random.PRNGKey(0)
    k_img, k_par = jax.random.split(key)

    B, H, W = 2, 16, 16
    img = jax.random.normal(k_img, (B, IMG_C, H, W), dtype=jnp.float32)

    raw = build_raw_params(k_par)
    packed = pack_params(raw)

    fwd = jax.jit(lambda x: illumination_estimator(x, packed))
    illu_fea, illu_map = jax.block_until_ready(fwd(img))

    # shape / sanity checks
    assert illu_fea.shape == (B, N_FEA_MID, H, W), illu_fea.shape
    assert illu_map.shape == (B, N_FEA_OUT, H, W), illu_map.shape
    assert bool(jnp.all(jnp.isfinite(illu_fea)))
    assert bool(jnp.all(jnp.isfinite(illu_map)))

    # numerical check against a full-f32 XLA reference (kernel uses bf16 MXU
    # operands with f32 accumulation for the depth conv only).
    ref_fea, ref_map = jax.jit(lambda x: reference_forward(x, raw))(img)
    err_fea = float(jnp.max(jnp.abs(illu_fea - ref_fea)))
    err_map = float(jnp.max(jnp.abs(illu_map - ref_map)))
    assert err_fea < 2e-2, err_fea
    assert err_map < 2e-2, err_map

    print("KERNEL_OK")
</pallas_src>

<mosaic_0001>
module attributes {stable_mosaic.version = 11 : i64} {
  func.func @_illum_kernel(%arg0: i32, %arg1: i32, %arg2: memref<1x1x4x256xf32, #tpu.memory_space<vmem>>, %arg3: memref<5x256xf32, #tpu.memory_space<vmem>>, %arg4: memref<40x4xf32, #tpu.memory_space<vmem>>, %arg5: memref<40x1000xbf16, #tpu.memory_space<vmem>>, %arg6: memref<40x1xf32, #tpu.memory_space<vmem>>, %arg7: memref<3x40xf32, #tpu.memory_space<vmem>>, %arg8: memref<3x1xf32, #tpu.memory_space<vmem>>, %arg9: memref<1x40x128xf32, #tpu.memory_space<vmem>>, %arg10: memref<1x3x128xf32, #tpu.memory_space<vmem>>, %arg11: memref<1000x128xf32, #tpu.memory_space<vmem>>) attributes {dimension_semantics = [#tpu.dimension_semantics<parallel>, #tpu.dimension_semantics<parallel>], iteration_bounds = array<i64: 2, 2>, scalar_prefetch = 0 : i64, scratch_operands = 1 : i64, tpu.core_type = #tpu.core_type<tc>, window_params = [{transform_indices = @transform_0, window_bounds = array<i64: 1, 1, 4, 256>}, {pipeline_mode = #tpu.pipeline_mode<synchronous>, transform_indices = @transform_1, window_bounds = array<i64: 5, 256>}, {pipeline_mode = #tpu.pipeline_mode<synchronous>, transform_indices = @transform_2, window_bounds = array<i64: 40, 4>}, {pipeline_mode = #tpu.pipeline_mode<synchronous>, transform_indices = @transform_3, window_bounds = array<i64: 40, 1000>}, {pipeline_mode = #tpu.pipeline_mode<synchronous>, transform_indices = @transform_4, window_bounds = array<i64: 40, 1>}, {pipeline_mode = #tpu.pipeline_mode<synchronous>, transform_indices = @transform_5, window_bounds = array<i64: 3, 40>}, {pipeline_mode = #tpu.pipeline_mode<synchronous>, transform_indices = @transform_6, window_bounds = array<i64: 3, 1>}, {transform_indices = @transform_7, window_bounds = array<i64: 1, 40, 128>}, {transform_indices = @transform_8, window_bounds = array<i64: 1, 3, 128>}]} {
    %c0 = arith.constant 0 : index
    %c0_0 = arith.constant 0 : index
    %c0_1 = arith.constant 0 : index
    %c0_2 = arith.constant 0 : index
    %0 = vector.load %arg2[%c0, %c0_0, %c0_1, %c0_2] : memref<1x1x4x256xf32, #tpu.memory_space<vmem>>, vector<1x1x4x256xf32>
    %1 = vector.shape_cast %0 : vector<1x1x4x256xf32> to vector<4x256xf32>
    %c0_3 = arith.constant 0 : index
    %c0_4 = arith.constant 0 : index
    %2 = vector.load %arg4[%c0_3, %c0_4] : memref<40x4xf32, #tpu.memory_space<vmem>>, vector<40x4xf32>
    %cst = arith.constant dense<0.000000e+00> : vector<40x256xf32>
    %3 = tpu.matmul %2, %1, %cst {dimension_numbers = #tpu.dot_dimension_numbers<[1], [0], [0], [1], [0, 0, 1, 1], [], []>} : vector<40x4xf32>, vector<4x256xf32>, vector<40x256xf32> -> vector<40x256xf32>
    %c2_i32 = arith.constant 2 : i32
    %4 = tpu.dynamic_rotate %3 by %c2_i32 dim 1 : vector<40x256xf32>, i32 -> vector<40x256xf32>
    %c0_5 = arith.constant 0 : index
    %c0_6 = arith.constant 0 : index
    %5 = vector.load %arg3[%c0_5, %c0_6] : memref<5x256xf32, #tpu.memory_space<vmem>>, vector<1x256xf32>
    %6 = vector.broadcast %5 : vector<1x256xf32> to vector<40x256xf32>
    %7 = arith.mulf %4, %6 : vector<40x256xf32>
    %8 = vector.extract_strided_slice %7 {offsets = [0, 0], sizes = [40, 128], strides = [1, 1]} : vector<40x256xf32> to vector<40x128xf32>
    %c0_7 = arith.constant 0 : index
    %c0_8 = arith.constant 0 : index
    %9 = vector.load %arg11[%c0_7, %c0_8] : memref<1000x128xf32, #tpu.memory_space<vmem>>, vector<40x128xf32>
    tpu.vector_store %arg11[%c0_7, %c0_8], %8 {strides = array<i32>} : memref<1000x128xf32, #tpu.memory_space<vmem>>, vector<40x128xf32>,
    %c240_i32 = arith.constant 240 : i32
    %10 = tpu.dynamic_rotate %7 by %c240_i32 dim 1 : vector<40x256xf32>, i32 -> vector<40x256xf32>
    %11 = vector.extract_strided_slice %10 {offsets = [0, 0], sizes = [40, 128], strides = [1, 1]} : vector<40x256xf32> to vector<40x128xf32>
    %c200 = arith.constant 200 : index
    %c0_9 = arith.constant 0 : index
    %12 = vector.load %arg11[%c200, %c0_9] : memref<1000x128xf32, #tpu.memory_space<vmem>>, vector<40x128xf32>
    tpu.vector_store %arg11[%c200, %c0_9], %11 {strides = array<i32>} : memref<1000x128xf32, #tpu.memory_space<vmem>>, vector<40x128xf32>,
    %c224_i32 = arith.constant 224 : i32
    %13 = tpu.dynamic_rotate %7 by %c224_i32 dim 1 : vector<40x256xf32>, i32 -> vector<40x256xf32>
    %14 = vector.extract_strided_slice %13 {offsets = [0, 0], sizes = [40, 128], strides = [1, 1]} : vector<40x256xf32> to vector<40x128xf32>
    %c400 = arith.constant 400 : index
    %c0_10 = arith.constant 0 : index
    %15 = vector.load %arg11[%c400, %c0_10] : memref<1000x128xf32, #tpu.memory_space<vmem>>, vector<40x128xf32>
    tpu.vector_store %arg11[%c400, %c0_10], %14 {strides = array<i32>} : memref<1000x128xf32, #tpu.memory_space<vmem>>, vector<40x128xf32>,
    %c208_i32 = arith.constant 208 : i32
    %16 = tpu.dynamic_rotate %7 by %c208_i32 dim 1 : vector<40x256xf32>, i32 -> vector<40x256xf32>
    %17 = vector.extract_strided_slice %16 {offsets = [0, 0], sizes = [40, 128], strides = [1, 1]} : vector<40x256xf32> to vector<40x128xf32>
    %c600 = arith.constant 600 : index
    %c0_11 = arith.constant 0 : index
    %18 = vector.load %arg11[%c600, %c0_11] : memref<1000x128xf32, #tpu.memory_space<vmem>>, vector<40x128xf32>
    tpu.vector_store %arg11[%c600, %c0_11], %17 {strides = array<i32>} : memref<1000x128xf32, #tpu.memory_space<vmem>>, vector<40x128xf32>,
    %c192_i32 = arith.constant 192 : i32
    %19 = tpu.dynamic_rotate %7 by %c192_i32 dim 1 : vector<40x256xf32>, i32 -> vector<40x256xf32>
    %20 = vector.extract_strided_slice %19 {offsets = [0, 0], sizes = [40, 128], strides = [1, 1]} : vector<40x256xf32> to vector<40x128xf32>
    %c800 = arith.constant 800 : index
    %c0_12 = arith.constant 0 : index
    %21 = vector.load %arg11[%c800, %c0_12] : memref<1000x128xf32, #tpu.memory_space<vmem>>, vector<40x128xf32>
    tpu.vector_store %arg11[%c800, %c0_12], %20 {strides = array<i32>} : memref<1000x128xf32, #tpu.memory_space<vmem>>, vector<40x128xf32>,
    %c1_i32 = arith.constant 1 : i32
    %22 = tpu.dynamic_rotate %3 by %c1_i32 dim 1 : vector<40x256xf32>, i32 -> vector<40x256xf32>
    %c1 = arith.constant 1 : index
    %c0_13 = arith.constant 0 : index
    %23 = vector.load %arg3[%c1, %c0_13] : memref<5x256xf32, #tpu.memory_space<vmem>>, vector<1x256xf32>
    %24 = vector.broadcast %23 : vector<1x256xf32> to vector<40x256xf32>
    %25 = arith.mulf %22, %24 : vector<40x256xf32>
    %26 = vector.extract_strided_slice %25 {offsets = [0, 0], sizes = [40, 128], strides = [1, 1]} : vector<40x256xf32> to vector<40x128xf32>
    %c40 = arith.constant 40 : index
    %c0_14 = arith.constant 0 : index
    %27 = vector.load %arg11[%c40, %c0_14] : memref<1000x128xf32, #tpu.memory_space<vmem>>, vector<40x128xf32>
    tpu.vector_store %arg11[%c40, %c0_14], %26 {strides = array<i32>} : memref<1000x128xf32, #tpu.memory_space<vmem>>, vector<40x128xf32>,
    %c240_i32_15 = arith.constant 240 : i32
    %28 = tpu.dynamic_rotate %25 by %c240_i32_15 dim 1 : vector<40x256xf32>, i32 -> vector<40x256xf32>
    %29 = vector.extract_strided_slice %28 {offsets = [0, 0], sizes = [40, 128], strides = [1, 1]} : vector<40x256xf32> to vector<40x128xf32>
    %c240 = arith.constant 240 : index
    %c0_16 = arith.constant 0 : index
    %30 = vector.load %arg11[%c240, %c0_16] : memref<1000x128xf32, #tpu.memory_space<vmem>>, vector<40x128xf32>
    tpu.vector_store %arg11[%c240, %c0_16], %29 {strides = array<i32>} : memref<1000x128xf32, #tpu.memory_space<vmem>>, vector<40x128xf32>,
    %c224_i32_17 = arith.constant 224 : i32
    %31 = tpu.dynamic_rotate %25 by %c224_i32_17 dim 1 : vector<40x256xf32>, i32 -> vector<40x256xf32>
    %32 = vector.extract_strided_slice %31 {offsets = [0, 0], sizes = [40, 128], strides = [1, 1]} : vector<40x256xf32> to vector<40x128xf32>
    %c440 = arith.constant 440 : index
    %c0_18 = arith.constant 0 : index
    %33 = vector.load %arg11[%c440, %c0_18] : memref<1000x128xf32, #tpu.memory_space<vmem>>, vector<40x128xf32>
    tpu.vector_store %arg11[%c440, %c0_18], %32 {strides = array<i32>} : memref<1000x128xf32, #tpu.memory_space<vmem>>, vector<40x128xf32>,
    %c208_i32_19 = arith.constant 208 : i32
    %34 = tpu.dynamic_rotate %25 by %c208_i32_19 dim 1 : vector<40x256xf32>, i32 -> vector<40x256xf32>
    %35 = vector.extract_strided_slice %34 {offsets = [0, 0], sizes = [40, 128], strides = [1, 1]} : vector<40x256xf32> to vector<40x128xf32>
    %c640 = arith.constant 640 : index
    %c0_20 = arith.constant 0 : index
    %36 = vector.load %arg11[%c640, %c0_20] : memref<1000x128xf32, #tpu.memory_space<vmem>>, vector<40x128xf32>
    tpu.vector_store %arg11[%c640, %c0_20], %35 {strides = array<i32>} : memref<1000x128xf32, #tpu.memory_space<vmem>>, vector<40x128xf32>,
    %c192_i32_21 = arith.constant 192 : i32
    %37 = tpu.dynamic_rotate %25 by %c192_i32_21 dim 1 : vector<40x256xf32>, i32 -> vector<40x256xf32>
    %38 = vector.extract_strided_slice %37 {offsets = [0, 0], sizes = [40, 128], strides = [1, 1]} : vector<40x256xf32> to vector<40x128xf32>
    %c840 = arith.constant 840 : index
    %c0_22 = arith.constant 0 : index
    %39 = vector.load %arg11[%c840, %c0_22] : memref<1000x128xf32, #tpu.memory_space<vmem>>, vector<40x128xf32>
    tpu.vector_store %arg11[%c840, %c0_22], %38 {strides = array<i32>} : memref<1000x128xf32, #tpu.memory_space<vmem>>, vector<40x128xf32>,
    %40 = vector.extract_strided_slice %3 {offsets = [0, 0], sizes = [40, 128], strides = [1, 1]} : vector<40x256xf32> to vector<40x128xf32>
    %c80 = arith.constant 80 : index
    %c0_23 = arith.constant 0 : index
    %41 = vector.load %arg11[%c80, %c0_23] : memref<1000x128xf32, #tpu.memory_space<vmem>>, vector<40x128xf32>
    tpu.vector_store %arg11[%c80, %c0_23], %40 {strides = array<i32>} : memref<1000x128xf32, #tpu.memory_space<vmem>>, vector<40x128xf32>,
    %c240_i32_24 = arith.constant 240 : i32
    %42 = tpu.dynamic_rotate %3 by %c240_i32_24 dim 1 : vector<40x256xf32>, i32 -> vector<40x256xf32>
    %43 = vector.extract_strided_slice %42 {offsets = [0, 0], sizes = [40, 128], strides = [1, 1]} : vector<40x256xf32> to vector<40x128xf32>
    %c280 = arith.constant 280 : index
    %c0_25 = arith.constant 0 : index
    %44 = vector.load %arg11[%c280, %c0_25] : memref<1000x128xf32, #tpu.memory_space<vmem>>, vector<40x128xf32>
    tpu.vector_store %arg11[%c280, %c0_25], %43 {strides = array<i32>} : memref<1000x128xf32, #tpu.memory_space<vmem>>, vector<40x128xf32>,
    %c224_i32_26 = arith.constant 224 : i32
    %45 = tpu.dynamic_rotate %3 by %c224_i32_26 dim 1 : vector<40x256xf32>, i32 -> vector<40x256xf32>
    %46 = vector.extract_strided_slice %45 {offsets = [0, 0], sizes = [40, 128], strides = [1, 1]} : vector<40x256xf32> to vector<40x128xf32>
    %c480 = arith.constant 480 : index
    %c0_27 = arith.constant 0 : index
    %47 = vector.load %arg11[%c480, %c0_27] : memref<1000x128xf32, #tpu.memory_space<vmem>>, vector<40x128xf32>
    tpu.vector_store %arg11[%c480, %c0_27], %46 {strides = array<i32>} : memref<1000x128xf32, #tpu.memory_space<vmem>>, vector<40x128xf32>,
    %c208_i32_28 = arith.constant 208 : i32
    %48 = tpu.dynamic_rotate %3 by %c208_i32_28 dim 1 : vector<40x256xf32>, i32 -> vector<40x256xf32>
    %49 = vector.extract_strided_slice %48 {offsets = [0, 0], sizes = [40, 128], strides = [1, 1]} : vector<40x256xf32> to vector<40x128xf32>
    %c680 = arith.constant 680 : index
    %c0_29 = arith.constant 0 : index
    %50 = vector.load %arg11[%c680, %c0_29] : memref<1000x128xf32, #tpu.memory_space<vmem>>, vector<40x128xf32>
    tpu.vector_store %arg11[%c680, %c0_29], %49 {strides = array<i32>} : memref<1000x128xf32, #tpu.memory_space<vmem>>, vector<40x128xf32>,
    %c192_i32_30 = arith.constant 192 : i32
    %51 = tpu.dynamic_rotate %3 by %c192_i32_30 dim 1 : vector<40x256xf32>, i32 -> vector<40x256xf32>
    %52 = vector.extract_strided_slice %51 {offsets = [0, 0], sizes = [40, 128], strides = [1, 1]} : vector<40x256xf32> to vector<40x128xf32>
    %c880 = arith.constant 880 : index
    %c0_31 = arith.constant 0 : index
    %53 = vector.load %arg11[%c880, %c0_31] : memref<1000x128xf32, #tpu.memory_space<vmem>>, vector<40x128xf32>
    tpu.vector_store %arg11[%c880, %c0_31], %52 {strides = array<i32>} : memref<1000x128xf32, #tpu.memory_space<vmem>>, vector<40x128xf32>,
    %c255_i32 = arith.constant 255 : i32
    %54 = tpu.dynamic_rotate %3 by %c255_i32 dim 1 : vector<40x256xf32>, i32 -> vector<40x256xf32>
    %c3 = arith.constant 3 : index
    %c0_32 = arith.constant 0 : index
    %55 = vector.load %arg3[%c3, %c0_32] : memref<5x256xf32, #tpu.memory_space<vmem>>, vector<1x256xf32>
    %56 = vector.broadcast %55 : vector<1x256xf32> to vector<40x256xf32>
    %57 = arith.mulf %54, %56 : vector<40x256xf32>
    %58 = vector.extract_strided_slice %57 {offsets = [0, 0], sizes = [40, 128], strides = [1, 1]} : vector<40x256xf32> to vector<40x128xf32>
    %c120 = arith.constant 120 : index
    %c0_33 = arith.constant 0 : index
    %59 = vector.load %arg11[%c120, %c0_33] : memref<1000x128xf32, #tpu.memory_space<vmem>>, vector<40x128xf32>
    tpu.vector_store %arg11[%c120, %c0_33], %58 {strides = array<i32>} : memref<1000x128xf32, #tpu.memory_space<vmem>>, vector<40x128xf32>,
    %c240_i32_34 = arith.constant 240 : i32
    %60 = tpu.dynamic_rotate %57 by %c240_i32_34 dim 1 : vector<40x256xf32>, i32 -> vector<40x256xf32>
    %61 = vector.extract_strided_slice %60 {offsets = [0, 0], sizes = [40, 128], strides = [1, 1]} : vector<40x256xf32> to vector<40x128xf32>
    %c320 = arith.constant 320 : index
    %c0_35 = arith.constant 0 : index
    %62 = vector.load %arg11[%c320, %c0_35] : memref<1000x128xf32, #tpu.memory_space<vmem>>, vector<40x128xf32>
    tpu.vector_store %arg11[%c320, %c0_35], %61 {strides = array<i32>} : memref<1000x128xf32, #tpu.memory_space<vmem>>, vector<40x128xf32>,
    %c224_i32_36 = arith.constant 224 : i32
    %63 = tpu.dynamic_rotate %57 by %c224_i32_36 dim 1 : vector<40x256xf32>, i32 -> vector<40x256xf32>
    %64 = vector.extract_strided_slice %63 {offsets = [0, 0], sizes = [40, 128], strides = [1, 1]} : vector<40x256xf32> to vector<40x128xf32>
    %c520 = arith.constant 520 : index
    %c0_37 = arith.constant 0 : index
    %65 = vector.load %arg11[%c520, %c0_37] : memref<1000x128xf32, #tpu.memory_space<vmem>>, vector<40x128xf32>
    tpu.vector_store %arg11[%c520, %c0_37], %64 {strides = array<i32>} : memref<1000x128xf32, #tpu.memory_space<vmem>>, vector<40x128xf32>,
    %c208_i32_38 = arith.constant 208 : i32
    %66 = tpu.dynamic_rotate %57 by %c208_i32_38 dim 1 : vector<40x256xf32>, i32 -> vector<40x256xf32>
    %67 = vector.extract_strided_slice %66 {offsets = [0, 0], sizes = [40, 128], strides = [1, 1]} : vector<40x256xf32> to vector<40x128xf32>
    %c720 = arith.constant 720 : index
    %c0_39 = arith.constant 0 : index
    %68 = vector.load %arg11[%c720, %c0_39] : memref<1000x128xf32, #tpu.memory_space<vmem>>, vector<40x128xf32>
    tpu.vector_store %arg11[%c720, %c0_39], %67 {strides = array<i32>} : memref<1000x128xf32, #tpu.memory_space<vmem>>, vector<40x128xf32>,
    %c192_i32_40 = arith.constant 192 : i32
    %69 = tpu.dynamic_rotate %57 by %c192_i32_40 dim 1 : vector<40x256xf32>, i32 -> vector<40x256xf32>
    %70 = vector.extract_strided_slice %69 {offsets = [0, 0], sizes = [40, 128], strides = [1, 1]} : vector<40x256xf32> to vector<40x128xf32>
    %c920 = arith.constant 920 : index
    %c0_41 = arith.constant 0 : index
    %71 = vector.load %arg11[%c920, %c0_41] : memref<1000x128xf32, #tpu.memory_space<vmem>>, vector<40x128xf32>
    tpu.vector_store %arg11[%c920, %c0_41], %70 {strides = array<i32>} : memref<1000x128xf32, #tpu.memory_space<vmem>>, vector<40x128xf32>,
    %c254_i32 = arith.constant 254 : i32
    %72 = tpu.dynamic_rotate %3 by %c254_i32 dim 1 : vector<40x256xf32>, i32 -> vector<40x256xf32>
    %c4 = arith.constant 4 : index
    %c0_42 = arith.constant 0 : index
    %73 = vector.load %arg3[%c4, %c0_42] : memref<5x256xf32, #tpu.memory_space<vmem>>, vector<1x256xf32>
    %74 = vector.broadcast %73 : vector<1x256xf32> to vector<40x256xf32>
    %75 = arith.mulf %72, %74 : vector<40x256xf32>
    %76 = vector.extract_strided_slice %75 {offsets = [0, 0], sizes = [40, 128], strides = [1, 1]} : vector<40x256xf32> to vector<40x128xf32>
    %c160 = arith.constant 160 : index
    %c0_43 = arith.constant 0 : index
    %77 = vector.load %arg11[%c160, %c0_43] : memref<1000x128xf32, #tpu.memory_space<vmem>>, vector<40x128xf32>
    tpu.vector_store %arg11[%c160, %c0_43], %76 {strides = array<i32>} : memref<1000x128xf32, #tpu.memory_space<vmem>>, vector<40x128xf32>,
    %c240_i32_44 = arith.constant 240 : i32
    %78 = tpu.dynamic_rotate %75 by %c240_i32_44 dim 1 : vector<40x256xf32>, i32 -> vector<40x256xf32>
    %79 = vector.extract_strided_slice %78 {offsets = [0, 0], sizes = [40, 128], strides = [1, 1]} : vector<40x256xf32> to vector<40x128xf32>
    %c360 = arith.constant 360 : index
    %c0_45 = arith.constant 0 : index
    %80 = vector.load %arg11[%c360, %c0_45] : memref<1000x128xf32, #tpu.memory_space<vmem>>, vector<40x128xf32>
    tpu.vector_store %arg11[%c360, %c0_45], %79 {strides = array<i32>} : memref<1000x128xf32, #tpu.memory_space<vmem>>, vector<40x128xf32>,
    %c224_i32_46 = arith.constant 224 : i32
    %81 = tpu.dynamic_rotate %75 by %c224_i32_46 dim 1 : vector<40x256xf32>, i32 -> vector<40x256xf32>
    %82 = vector.extract_strided_slice %81 {offsets = [0, 0], sizes = [40, 128], strides = [1, 1]} : vector<40x256xf32> to vector<40x128xf32>
    %c560 = arith.constant 560 : index
    %c0_47 = arith.constant 0 : index
    %83 = vector.load %arg11[%c560, %c0_47] : memref<1000x128xf32, #tpu.memory_space<vmem>>, vector<40x128xf32>
    tpu.vector_store %arg11[%c560, %c0_47], %82 {strides = array<i32>} : memref<1000x128xf32, #tpu.memory_space<vmem>>, vector<40x128xf32>,
    %c208_i32_48 = arith.constant 208 : i32
    %84 = tpu.dynamic_rotate %75 by %c208_i32_48 dim 1 : vector<40x256xf32>, i32 -> vector<40x256xf32>
    %85 = vector.extract_strided_slice %84 {offsets = [0, 0], sizes = [40, 128], strides = [1, 1]} : vector<40x256xf32> to vector<40x128xf32>
    %c760 = arith.constant 760 : index
    %c0_49 = arith.constant 0 : index
    %86 = vector.load %arg11[%c760, %c0_49] : memref<1000x128xf32, #tpu.memory_space<vmem>>, vector<40x128xf32>
    tpu.vector_store %arg11[%c760, %c0_49], %85 {strides = array<i32>} : memref<1000x128xf32, #tpu.memory_space<vmem>>, vector<40x128xf32>,
    %c192_i32_50 = arith.constant 192 : i32
    %87 = tpu.dynamic_rotate %75 by %c192_i32_50 dim 1 : vector<40x256xf32>, i32 -> vector<40x256xf32>
    %88 = vector.extract_strided_slice %87 {offsets = [0, 0], sizes = [40, 128], strides = [1, 1]} : vector<40x256xf32> to vector<40x128xf32>
    %c960 = arith.constant 960 : index
    %c0_51 = arith.constant 0 : index
    %89 = vector.load %arg11[%c960, %c0_51] : memref<1000x128xf32, #tpu.memory_space<vmem>>, vector<40x128xf32>
    tpu.vector_store %arg11[%c960, %c0_51], %88 {strides = array<i32>} : memref<1000x128xf32, #tpu.memory_space<vmem>>, vector<40x128xf32>,
    %c0_52 = arith.constant 0 : index
    %c0_53 = arith.constant 0 : index
    %90 = vector.load %arg5[%c0_52, %c0_53] : memref<40x1000xbf16, #tpu.memory_space<vmem>>, vector<40x1000xbf16>
    %c0_54 = arith.constant 0 : index
    %c0_55 = arith.constant 0 : index
    %91 = vector.load %arg11[%c0_54, %c0_55] : memref<1000x128xf32, #tpu.memory_space<vmem>>, vector<1000x128xf32>
    %92 = arith.truncf %91 : vector<1000x128xf32> to vector<1000x128xbf16>
    %cst_56 = arith.constant dense<0.000000e+00> : vector<40x128xf32>
    %93 = tpu.matmul %90, %92, %cst_56 {dimension_numbers = #tpu.dot_dimension_numbers<[1], [0], [0], [1], [0, 0, 1, 1], [], []>} : vector<40x1000xbf16>, vector<1000x128xbf16>, vector<40x128xf32> -> vector<40x128xf32>
    %c0_57 = arith.constant 0 : index
    %c0_58 = arith.constant 0 : index
    %94 = vector.load %arg6[%c0_57, %c0_58] : memref<40x1xf32, #tpu.memory_space<vmem>>, vector<40x1xf32>
    %95 = vector.broadcast %94 : vector<40x1xf32> to vector<40x128xf32>
    %96 = arith.addf %93, %95 : vector<40x128xf32>
    %c0_59 = arith.constant 0 : index
    %c0_60 = arith.constant 0 : index
    %c0_61 = arith.constant 0 : index
    %97 = vector.load %arg9[%c0_59, %c0_60, %c0_61] : memref<1x40x128xf32, #tpu.memory_space<vmem>>, vector<1x40x128xf32>
    %98 = vector.shape_cast %97 : vector<1x40x128xf32> to vector<40x128xf32>
    %99 = vector.shape_cast %96 : vector<40x128xf32> to vector<1x40x128xf32>
    tpu.vector_store %arg9[%c0_59, %c0_60, %c0_61], %99 {strides = array<i32>} : memref<1x40x128xf32, #tpu.memory_space<vmem>>, vector<1x40x128xf32>,
    %c0_62 = arith.constant 0 : index
    %c0_63 = arith.constant 0 : index
    %100 = vector.load %arg7[%c0_62, %c0_63] : memref<3x40xf32, #tpu.memory_space<vmem>>, vector<3x40xf32>
    %cst_64 = arith.constant dense<0.000000e+00> : vector<3x128xf32>
    %101 = tpu.matmul %100, %96, %cst_64 {dimension_numbers = #tpu.dot_dimension_numbers<[1], [0], [0], [1], [0, 0, 1, 1], [], []>} : vector<3x40xf32>, vector<40x128xf32>, vector<3x128xf32> -> vector<3x128xf32>
    %c0_65 = arith.constant 0 : index
    %c0_66 = arith.constant 0 : index
    %102 = vector.load %arg8[%c0_65, %c0_66] : memref<3x1xf32, #tpu.memory_space<vmem>>, vector<3x1xf32>
    %103 = vector.broadcast %102 : vector<3x1xf32> to vector<3x128xf32>
    %104 = arith.addf %101, %103 : vector<3x128xf32>
    %c0_67 = arith.constant 0 : index
    %c0_68 = arith.constant 0 : index
    %c0_69 = arith.constant 0 : index
    %105 = vector.load %arg10[%c0_67, %c0_68, %c0_69] : memref<1x3x128xf32, #tpu.memory_space<vmem>>, vector<1x3x128xf32>
    %106 = vector.shape_cast %105 : vector<1x3x128xf32> to vector<3x128xf32>
    %107 = vector.shape_cast %104 : vector<3x128xf32> to vector<1x3x128xf32>
    tpu.vector_store %arg10[%c0_67, %c0_68, %c0_69], %107 {strides = array<i32>} : memref<1x3x128xf32, #tpu.memory_space<vmem>>, vector<1x3x128xf32>,
    return
  }
  func.func @transform_0(%arg0: i32, %arg1: i32) -> (i32, i32, i32, i32) {
    %c0_i32 = arith.constant 0 : i32
    %c0_i32_0 = arith.constant 0 : i32
    %c0_i32_1 = arith.constant 0 : i32
    return %arg0, %arg1, %c0_i32, %c0_i32_0 : i32, i32, i32, i32
  }
  func.func @transform_1(%arg0: i32, %arg1: i32) -> (i32, i32) {
    %c0_i32 = arith.constant 0 : i32
    %c0_i32_0 = arith.constant 0 : i32
    %c0_i32_1 = arith.constant 0 : i32
    return %c0_i32, %c0_i32_0 : i32, i32
  }
  func.func @transform_2(%arg0: i32, %arg1: i32) -> (i32, i32) {
    %c0_i32 = arith.constant 0 : i32
    %c0_i32_0 = arith.constant 0 : i32
    %c0_i32_1 = arith.constant 0 : i32
    return %c0_i32, %c0_i32_0 : i32, i32
  }
  func.func @transform_3(%arg0: i32, %arg1: i32) -> (i32, i32) {
    %c0_i32 = arith.constant 0 : i32
    %c0_i32_0 = arith.constant 0 : i32
    %c0_i32_1 = arith.constant 0 : i32
    return %c0_i32, %c0_i32_0 : i32, i32
  }
  func.func @transform_4(%arg0: i32, %arg1: i32) -> (i32, i32) {
    %c0_i32 = arith.constant 0 : i32
    %c0_i32_0 = arith.constant 0 : i32
    %c0_i32_1 = arith.constant 0 : i32
    return %c0_i32, %c0_i32_0 : i32, i32
  }
  func.func @transform_5(%arg0: i32, %arg1: i32) -> (i32, i32) {
    %c0_i32 = arith.constant 0 : i32
    %c0_i32_0 = arith.constant 0 : i32
    %c0_i32_1 = arith.constant 0 : i32
    return %c0_i32, %c0_i32_0 : i32, i32
  }
  func.func @transform_6(%arg0: i32, %arg1: i32) -> (i32, i32) {
    %c0_i32 = arith.constant 0 : i32
    %c0_i32_0 = arith.constant 0 : i32
    %c0_i32_1 = arith.constant 0 : i32
    return %c0_i32, %c0_i32_0 : i32, i32
  }
  func.func @transform_7(%arg0: i32, %arg1: i32) -> (i32, i32, i32) {
    %c0_i32 = arith.constant 0 : i32
    %c0_i32_0 = arith.constant 0 : i32
    return %arg0, %c0_i32, %arg1 : i32, i32, i32
  }
  func.func @transform_8(%arg0: i32, %arg1: i32) -> (i32, i32, i32) {
    %c0_i32 = arith.constant 0 : i32
    %c0_i32_0 = arith.constant 0 : i32
    return %arg0, %c0_i32, %arg1 : i32, i32, i32
  }
}

</mosaic_0001>

<bundles_post_ra>
// kernel: _lambda_.1
= control target key start
LH: loop header
LB: loop body
LE: loop exit
PB: predicated region body
PF: predicated region fallthrough
CT: control target
= control target key end

     0   :  { %s3031_s27 = smov 0   ;;  %s3033_s28 = smov 0   ;;  %s4407_s0 = inlined_call_operand.vmem [shape: f32[2,2,4,256], index: 0, kind: input, shape index: {}]   ;;  %s4408_s1 = inlined_call_operand.vmem [shape: f32[5,256], index: 1, kind: input, shape index: {}]   ;;  %s4409_s2 = inlined_call_operand.vmem [shape: f32[40,4], index: 2, kind: input, shape index: {}]   ;;  %s4410_s3 = inlined_call_operand.vmem [shape: bf16[40,1000], index: 3, kind: input, shape index: {}]   ;;  %s4411_s4 = inlined_call_operand.vmem [shape: f32[40,1], index: 4, kind: input, shape index: {}]   ;;  %s4412_s5 = inlined_call_operand.vmem [shape: f32[3,40], index: 5, kind: input, shape index: {}]   ;;  %s4413_s6 = inlined_call_operand.vmem [shape: f32[3,1], index: 6, kind: input, shape index: {}]   ;;  %s4414_s7 = inlined_call_operand.vmem [shape: f32[2,40,256], index: 7, kind: output, shape index: {0}]   ;;  %s4415_s8 = inlined_call_operand.vmem [shape: f32[2,3,256], index: 8, kind: output, shape index: {1}]  }
   0x1   :  { %s3035_s29 = smov 0   ;;  %s3037_s30 = smov 0  }
   0x2   :  { %s3039_s9 = smov 0   ;;  %s3041_s10 = smov 0  }
   0x3   :  { %s3043_s11 = smov 0  }
   0x4 LB: > { %s28_s12 = sadd.s32 1, %s2965_s9  ;;  %s31_s13 = sadd.s32 1, %s2969_s10  ;;  %s2973_s11 = sphi %s3043_s11, %s19_s11   ;;  %s2969_s10 = sphi %s3041_s10, %s4541_s10   ;;  %s2965_s9 = sphi %s3039_s9, %s4540_s9   ;;  %s2961_s30 = sphi %s3037_s30, %s4539_s30   ;;  %s2957_s29 = sphi %s3035_s29, %s4538_s29   ;;  %s2953_s28 = sphi %s3033_s28, %s4537_s28   ;;  %s2949_s27 = sphi %s3031_s27, %s4536_s27  }
   0x5   : > { %p29_p0 = scmp.ge.s32.totalorder %s28_s12, 2  ;;  %s2167_s14 = sadd.s32 4294967295, %s2973_s11  }
   0x6   : > { %p204_p1 = scmp.ne.s32.totalorder %s2953_s28, %s2949_s27  ;;  %p205_p2 = scmp.eq.s32.totalorder %s2167_s14, 3 }
   0x7   : > { %s4543_s12 = smov (%p29_p0, %s28_s12), 0  ;;  %s4545_s13 = smov (!%p29_p0, %s31_s13), %s2969_s10 }
   0x8   : > { %s190_s15 = ssub.s32 %s2965_s9, %s4543_s12  ;;  %p33_p3 = scmp.ge.s32.totalorder %s4545_s13, 2 }
   0x9   : > { %p2171_p4 = scmp.ge.s32.totalorder %s2973_s11, 1  ;;  %p3077_p5 = por %p205_p2, %p204_p1 }
   0xa   : > { %p287_p6 = scmp.lt.s32.totalorder %s2973_s11, 5  ;;  %s4547_s13 = smov (%p33_p3, %s4545_s13), 0 }
   0xb   : > { %s189_s17 = ssub.s32 %s2969_s10, %s4547_s13  ;;  %s194_s19 = sadd.s32 1, %s2953_s28 }
   0xc   : > { %p288_p7 = pnand %p2171_p4, %p287_p6  ;;  %s191_s18 = sor.u32 %s190_s15, %s189_s17 }
   0xd   : > { %p192_p8 = scmp.eq.s32.totalorder %s191_s18, 0 }
   0xe   : > { %291 = sbr.rel (%p288_p7) target bundleno = 1081 (0x439), region = 48 }
   0xf   : > { %s3088_s20 = scalar_select %p192_p8, %s2953_s28, %s194_s19  }
  0x13   : > { %p332_p9 = scmp.lt.s32.totalorder %s2961_s30, 1  ;;  %p334_p10 = scmp.lt.s32.totalorder %s2957_s29, 1  ;;  %v4416_v0 = vmov 0.0   ;;  %vm374_vm0 = vcmask 1043456   ;;  %v351_v3 = vld [vmem:[%s4409_s2] sm:$0xff]  ;;  %vm358_vm1 = vcmask 31744   ;;  %v494_v29 = vlaneseq }
  0x14   : > { %443 = vmatprep.mubr.f32.mxu1 %v4416_v0  ;;  %v352_v4 = vld [vmem:[%s4409_s2 + $0x8] sm:$0xff]  ;;  %v353_v5 = vld [vmem:[%s4409_s2 + $0x10] sm:$0xff]  ;;  %v354_v6 = vld [vmem:[%s4409_s2 + $0x18] sm:$0xff]  ;;  %s2976_s19 = smov 126   ;;  %s2981_s14 = smov 96   ;;  %vm1663_vm10 = vcmask 850944  }
  0x15   : > { %s3094_s21 = scalar_select %p332_p9, %s2961_s30, 1  ;;  %v355_v7 = vld [vmem:[%s4409_s2 + $0x20] sm:$0xff]  ;;  %v510_v30 = vshrl.u32 %v494_v29, 7  ;;  %v3243_v31 = vand.u32 127, %v494_v29  ;;  %vm2985_vm11 = vmmov 0   ;;  %vm1912_vm12 = vcmask 326656  }
  0x16   : > { %s3097_s22 = scalar_select %p334_p10, %s2957_s29, 1  ;;  %v2186_v34 = vld [vmem:[%s4408_s1 + $0x4] ss:$8 sm:$0x3] }
  0x17   : > { %s2173_s23 = sshll.u32 %s3094_s21, 2  ;;  %s2982_s15 = smov 64   ;;  %v511_v32 = vsub.s32 0, %v510_v30  ;;  %v515_v33 = vsub.s32 1, %v510_v30  ;;  %vm1161_vm2 = vcmp.lt.s32.totalorder %v3243_v31, 126  ;;  %vm678_vm3 = vcmp.lt.s32.totalorder %v3243_v31, 1 }
  0x18   : > { %s2172_s24 = sshll.u32 %s3097_s22, 1  ;;  %v2184_v41 = vld [vmem:[%s4408_s1 + $0x1] ss:$8 sm:$0x3]  ;;  %vm982_vm4 = vcmp.lt.s32.totalorder %v3243_v31, 127  ;;  %vm496_vm5 = vcmp.lt.s32.totalorder %v3243_v31, 2 }
  0x19   : > { %s338_s25 = sadd.s32 %s2173_s23, %s2172_s24  ;;  %s2977_s23 = smov 127   ;;  %v3249_v36 = vrot.slane %v2186_v34, %v511_v32  ;;  %v3251_v37 = vrot.slane %v2186_v34, %v515_v33  ;;  %v3265_v46 = vrot.slane %v2184_v41, %v511_v32  ;;  %v3267_v47 = vrot.slane %v2184_v41, %v515_v33  ;;  %v2185_v55 = vld [vmem:[%s4408_s1 + $0x3] ss:$8 sm:$0x3] }
  0x1a   : > { %s2174_s26 = sshll.u32 %s338_s25, 2  ;;  %s2978_s24 = smov 1   ;;  %v3290_v59 = vrot.slane %v2185_v55, %v511_v32  ;;  %v3292_v60 = vrot.slane %v2185_v55, %v515_v33  ;;  %v507_v61 = vld [vmem:[%s4408_s1] ss:$8 sm:$0x3]  ;;  %vm585_vm6 = vcmp.lt.s32.totalorder %v3243_v31, 96 }
  0x1b   : > { %s340_s17 = scalar_lea.vmem %s4407_s0, %s2174_s26  ;;  %s2979_s25 = smov 112   ;;  %vm554_vm7 = vcmp.lt.s32.totalorder %v3243_v31, 112  ;;  %vm616_vm8 = vcmp.lt.s32.totalorder %v3243_v31, 80  ;;  %vm647_vm9 = vcmp.lt.s32.totalorder %v3243_v31, 64 }
  0x1c   : > { %v350_v1 = vld [vmem:[%s340_s17] sm:$0xff]  ;;  %s2980_s26 = smov 2   ;;  %s2983_s17 = smov 80  }
  0x1d   : > { %v357_v2 = vcombine.high %v350_v1, %v350_v1  ;;  %s2175_s18 = sshll.u32 %s3094_s21, 1  ;;  %s2340_s21 = smul.u32 (%p3077_p5), 10, %s2961_s30 }
  0x1f   : > { %2177 = vmatprep.subr.msk.mxu1 %vm374_vm0, %v357_v2 }
  0x20   : > { %2178 = vmatpush1.msk.msra.mxu1 %vm374_vm0, %v350_v1 }
  0x21   : > { %2179 = vmatmul.mubr.msk.f32.vlgmr.msra.gmra.mxu1 %vm358_vm1, %v351_v3 }
  0x22   : > { %449 = vmatprep.mubr.f32.mxu1 %v4416_v0 }
  0x25   : > { %2180 = vmatmul.mubr.msk.f32.gmra.mxu1 %vm358_vm1, %v352_v4 }
  0x26   : > { %455 = vmatprep.mubr.f32.mxu1 %v4416_v0 }
  0x29   : > { %2181 = vmatmul.mubr.msk.f32.gmra.mxu1 %vm358_vm1, %v353_v5  ;;  %v3306_v5 = vrot.slane %v507_v61, %v511_v32 }
  0x2a   : > { %461 = vmatprep.mubr.f32.mxu1 %v4416_v0 }
  0x2d   : > { %2182 = vmatmul.mubr.msk.f32.gmra.mxu1 %vm358_vm1, %v354_v6  ;;  %v3308_v6 = vrot.slane %v507_v61, %v515_v33 }
  0x2e   : > { %467 = vmatprep.mubr.f32.mxu1 %v4416_v0 }
  0x31   : > { %2183 = vmatmul.mubr.msk.f32.gmra.mxu1 %vm358_vm1, %v355_v7 }
  0xe1   : > { %v3125_v8 = vpop.f32.mrf.mxu1 }
  0xe2   : > { %4449 = vst [vmem:[#allocation4_spill] sm:$0xff] %v3125_v8  ;;  %1141 = vrot.lane.b32.xlu0 %v3125_v8, %s2976_s19 }
  0xe3   : > { %v447_v9 = vpop.f32.mrf.mxu1 }
  0xe4   : > { %1151 = vrot.lane.b32.xlu1 %v447_v9, %s2976_s19  ;;  %v3131_v10 = vpack.i.bf16 %v447_v9, %v3125_v8 }
  0xe5   : > { %v3133_v11 = vpop.f32.mrf.mxu1 }
  0xe6   : > { %4450 = vst [vmem:[#allocation5_spill] sm:$0xff] %v3133_v11  ;;  %962 = vrot.lane.b32.xlu0 %v3125_v8, %s2977_s23  ;;  %v2413_v21 = vpack.i.bf16 %v3133_v11, %v3125_v8 }
  0xe7   : > { %v453_v13 = vpop.f32.mrf.mxu1 }
  0xe8   : > { %668 = vrot.lane.b32.xlu1 %v447_v9, %s2978_s24  ;;  %v2423_v22 = vpack.i.bf16 %v453_v13, %v447_v9 }
  0xe9   : > { %v3140_v14 = vpop.f32.mrf.mxu1 }
  0xea   : > { %658 = vrot.lane.b32.xlu0 %v3125_v8, %s2978_s24  ;;  %v3146_v15 = vpack.i.bf16 %v3140_v14, %v3133_v11 }
  0xeb   : > { %v459_v16 = vpop.f32.mrf.mxu1 }
  0xec   : > { %2409 = vrot.lane.b32.xlu1 %v3131_v10, %s2979_s25  ;;  %v3150_v17 = vpack.i.bf16 %v459_v16, %v453_v13 }
  0xed   : > { %v3152_v18 = vpop.f32.mrf.mxu1 }
  0xee   : > { %474 = vrot.lane.b32.xlu0 %v3125_v8, %s2980_s26  ;;  %v3158_v19 = vpack.i.bf16 %v3152_v18, %v3140_v14 }
  0xef   : > { %v465_v23 = vpop.f32.mrf.mxu1 }
  0xf0   : > { %964 = vrot.lane.b32.xlu1 %v3133_v11, %s2977_s23  ;;  %v3208_v24 = vpack.i.bf16 %v465_v23, %v459_v16 }
  0xf1   : > { %v3214_v25 = vpop.f32.mrf.mxu1 }
  0xf2   : > { %972 = vrot.lane.b32.xlu0 %v447_v9, %s2977_s23  ;;  %v2453_v27 = vpack.i.bf16 %v3214_v25, %v3152_v18 }
  0xf3   : > { %v3222_v26 = vpop.f32.mrf.mxu1 }
  0xf4   : > { %476 = vrot.lane.b32.xlu1 %v3133_v11, %s2980_s26  ;;  %v2463_v28 = vpack.i.bf16 %v3222_v26, %v465_v23 }
  0xf6   : > { %484 = vrot.lane.b32.xlu0 %v447_v9, %s2980_s26 }
  0xf8   : > { %1153 = vrot.lane.b32.xlu1 %v453_v13, %s2976_s19 }
  0xfa   : > { %1143 = vrot.lane.b32.xlu0 %v3133_v11, %s2976_s19 }
  0xfc   : > { %974 = vrot.lane.b32.xlu1 %v453_v13, %s2977_s23 }
  0xfe   : > { %660 = vrot.lane.b32.xlu0 %v3133_v11, %s2978_s24 }
 0x100   : > { %486 = vrot.lane.b32.xlu1 %v453_v13, %s2980_s26 }
 0x102   : > { %2414 = vrot.lane.b32.xlu0 %v2413_v21, %s2981_s14 }
 0x104   : > { %2424 = vrot.lane.b32.xlu1 %v2423_v22, %s2981_s14 }
 0x106   : > { %2419 = vrot.lane.b32.xlu0 %v2413_v21, %s2982_s15 }
 0x108   : > { %2429 = vrot.lane.b32.xlu1 %v2423_v22, %s2982_s15 }
 0x10a   : > { %670 = vrot.lane.b32.xlu0 %v453_v13, %s2978_s24 }
 0x10c   : > { %662 = vrot.lane.b32.xlu1 %v3140_v14, %s2978_s24 }
 0x10e   : > { %1145 = vrot.lane.b32.xlu0 %v3140_v14, %s2976_s19 }
 0x110   : > { %1155 = vrot.lane.b32.xlu1 %v459_v16, %s2976_s19 }
 0x112   : > { %966 = vrot.lane.b32.xlu0 %v3140_v14, %s2977_s23 }
 0x114   : > { %672 = vrot.lane.b32.xlu1 %v459_v16, %s2978_s24 }
 0x116   : > { %478 = vrot.lane.b32.xlu0 %v3140_v14, %s2980_s26 }
 0x118   : > { %2439 = vrot.lane.b32.xlu1 %v3150_v17, %s2979_s25 }
 0x11a   : > { %2434 = vrot.lane.b32.xlu0 %v3146_v15, %s2979_s25 }
 0x11c   : > { %968 = vrot.lane.b32.xlu1 %v3152_v18, %s2977_s23 }
 0x11e   : > { %976 = vrot.lane.b32.xlu0 %v459_v16, %s2977_s23 }
 0x120   : > { %480 = vrot.lane.b32.xlu1 %v3152_v18, %s2980_s26 }
 0x122   : > { %488 = vrot.lane.b32.xlu0 %v459_v16, %s2980_s26 }
 0x124   : > { %978 = vrot.lane.b32.xlu1 %v465_v23, %s2977_s23 }
 0x126   : > { %664 = vrot.lane.b32.xlu0 %v3152_v18, %s2978_s24 }
 0x128   : > { %490 = vrot.lane.b32.xlu1 %v465_v23, %s2980_s26 }
 0x12a   : > { %1147 = vrot.lane.b32.xlu0 %v3152_v18, %s2976_s19 }
 0x12c   : > { %2449 = vrot.lane.b32.xlu1 %v3208_v24, %s2981_s14 }
 0x12e   : > { %2444 = vrot.lane.b32.xlu0 %v3158_v19, %s2981_s14 }
 0x130   : > { %666 = vrot.lane.b32.xlu1 %v3214_v25, %s2978_s24 }
 0x132   : > { %674 = vrot.lane.b32.xlu0 %v465_v23, %s2978_s24 }
 0x134   : > { %1149 = vrot.lane.b32.xlu1 %v3214_v25, %s2976_s19 }
 0x136   : > { %1157 = vrot.lane.b32.xlu0 %v465_v23, %s2976_s19 }
 0x138   : > { %980 = vrot.lane.b32.xlu1 %v3222_v26, %s2977_s23 }
 0x13a   : > { %970 = vrot.lane.b32.xlu0 %v3214_v25, %s2977_s23  ;;  %s346_s23 = sadd.s32 %s2175_s18, %s3097_s22  ;;  %s2003_s22 = sadd.s32 (%p3077_p5), %s2957_s29, %s2340_s21 }
 0x13c   : > { %676 = vrot.lane.b32.xlu1 %v3222_v26, %s2978_s24 }
 0x13e   : > { %482 = vrot.lane.b32.xlu0 %v3214_v25, %s2980_s26 }
 0x140   : > { %492 = vrot.lane.b32.xlu1 %v3222_v26, %s2980_s26  ;;  %s319_s26 = sand.u32 1, %s2949_s27  }
 0x142   : > { %2454 = vrot.lane.b32.xlu0 %v2453_v27, %s2979_s25 }
 0x144   : > { %1159 = vrot.lane.b32.xlu1 %v3222_v26, %s2976_s19 }
 0x146   : > { %2459 = vrot.lane.b32.xlu0 %v2453_v27, %s2983_s17 }
 0x148   : > { %2464 = vrot.lane.b32.xlu1 %v2463_v28, %s2979_s25 }
 0x14c   : > { %2469 = vrot.lane.b32.xlu1 %v2463_v28, %s2983_s17 }
 0x154   : > { %v1142_v35 = vpop.permute.xlu0 %1141 }
 0x156   : > { %v1152_v38 = vpop.permute.xlu1 %1151 }
 0x157   : > { %v1162_v39 = vsel %vm1161_vm2, %v1142_v35, %v1152_v38  ;;  %v1167_v40 = vsel %vm1161_vm2, %v1152_v38, %v1142_v35 }
 0x158   : > { %v3261_v42 = vmul.f32 %v3249_v36, %v1162_v39  ;;  %v1186_v43 = vmul.f32 %v3251_v37, %v1167_v40  ;;  %v963_v44 = vpop.permute.xlu0 %962 }
 0x15a   : > { %4451 = vst [vmem:[#allocation6_spill] sm:$0xff] %v3261_v42  ;;  %v669_v45 = vpop.permute.xlu1 %668  ;;  %v2473_v48 = vpack.i.bf16 %v1186_v43, %v3261_v42 }
 0x15c   : > { %v659_v49 = vpop.permute.xlu0 %658  ;;  %2474 = vrot.lane.b32.xlu1 %v2473_v48, %s2979_s25 }
 0x15d   : > { %v679_v50 = vsel %vm678_vm3, %v659_v49, %v669_v45  ;;  %v684_v51 = vsel %vm678_vm3, %v669_v45, %v659_v49 }
 0x15e   : > { %v3276_v52 = vmul.f32 %v3265_v46, %v684_v51  ;;  %v3279_v53 = vmul.f32 %v3267_v47, %v679_v50  ;;  %v3281_v54 = vpop.permute.xlu1 %2409 }
 0x160   : > { %4452 = vst [vmem:[#allocation7_spill] sm:$0xff] %v3276_v52  ;;  %v475_v56 = vpop.permute.xlu0 %474  ;;  %v2478_v57 = vpack.i.bf16 %v3279_v53, %v3276_v52 }
 0x162   : > { %v965_v58 = vpop.permute.xlu1 %964  ;;  %2479 = vrot.lane.b32.xlu1 %v2478_v57, %s2981_s14 }
 0x164   : > { %v973_v62 = vpop.permute.xlu0 %972 }
 0x165   : > { %v983_v63 = vsel %vm982_vm4, %v963_v44, %v973_v62  ;;  %v988_v1 = vsel %vm982_vm4, %v973_v62, %v963_v44 }
 0x166   : > { %v3303_v2 = vmul.f32 %v3290_v59, %v983_v63  ;;  %v1007_v3 = vmul.f32 %v3292_v60, %v988_v1  ;;  %v477_v4 = vpop.permute.xlu1 %476 }
 0x168   : > { %v485_v7 = vpop.permute.xlu0 %484  ;;  %v3311_v9 = vpack.i.bf16 %v1007_v3, %v3303_v2 }
 0x169   : > { %v497_v13 = vsel %vm496_vm5, %v475_v56, %v485_v7  ;;  %v502_v16 = vsel %vm496_vm5, %v485_v7, %v475_v56 }
 0x16a   : > { %v3318_v21 = vmul.f32 %v3306_v5, %v502_v16  ;;  %v520_v22 = vmul.f32 %v3308_v6, %v497_v13  ;;  %v1154_v23 = vpop.permute.xlu1 %1153 }
 0x16c   : > { %4453 = vst [vmem:[#allocation8_spill] sm:$0xff] %v3318_v21  ;;  %v1144_v27 = vpop.permute.xlu0 %1143  ;;  %v2483_v28 = vpack.i.bf16 %v520_v22, %v3318_v21 }
 0x16d   : > { %v1163_v29 = vsel %vm1161_vm2, %v1144_v27, %v1154_v23  ;;  %v1168_v30 = vsel %vm1161_vm2, %v1154_v23, %v1144_v27 }
 0x16e   : > { %v3327_v32 = vmul.f32 %v3249_v36, %v1163_v29  ;;  %v3330_v33 = vmul.f32 %v3251_v37, %v1168_v30  ;;  %v975_v34 = vpop.permute.xlu1 %974  ;;  %2484 = vrot.lane.b32.xlu0 %v2483_v28, %s2979_s25  ;;  %2499 = vrot.lane.b32.xlu1 %v2483_v28, %s2983_s17 }
 0x16f   : > { %v989_v35 = vsel %vm982_vm4, %v975_v34, %v965_v58  ;;  %v984_v41 = vsel %vm982_vm4, %v965_v58, %v975_v34 }
 0x170   : > { %4454 = vst [vmem:[#allocation9_spill] sm:$0xff] %v3327_v32  ;;  %v3337_v38 = vmul.f32 %v3292_v60, %v989_v35  ;;  %v661_v39 = vpop.permute.xlu0 %660  ;;  %v3340_v40 = vpack.i.bf16 %v3330_v33, %v1186_v43  ;;  %v3346_v44 = vpack.i.bf16 %v3327_v32, %v3261_v42  ;;  %v3355_v43 = vmul.f32 %v3290_v59, %v984_v41 }
 0x172   : > { %v487_v49 = vpop.permute.xlu1 %486  ;;  %2489 = vrot.lane.b32.xlu0 %v2478_v57, %s2982_s15  ;;  %v2508_v50 = vpack.i.bf16 %v3337_v38, %v1007_v3  ;;  %4455 = vst [vmem:[#allocation10_spill] sm:$0xff] %v3355_v43  ;;  %v2503_v62 = vpack.i.bf16 %v3355_v43, %v3303_v2 }
 0x173   : > { %v503_v51 = vsel %vm496_vm5, %v487_v49, %v477_v4  ;;  %v498_v3 = vsel %vm496_vm5, %v477_v4, %v487_v49 }
 0x174   : > { %v3358_v55 = vmul.f32 %v3306_v5, %v503_v51  ;;  %v3360_v56 = vpop.permute.xlu0 %2414  ;;  %2509 = vrot.lane.b32.xlu1 %v2508_v50, %s2979_s25  ;;  %v522_v27 = vmul.f32 %v3308_v6, %v498_v3 }
 0x176   : > { %4456 = vst [vmem:[#allocation11_spill] sm:$0xff] %v3358_v55  ;;  %v3363_v58 = vpop.permute.xlu1 %2424  ;;  %2494 = vrot.lane.b32.xlu0 %v2473_v48, %s2983_s17  ;;  %v2523_v35 = vpack.i.bf16 %v3358_v55, %v3318_v21 }
 0x178   : > { %v3368_v61 = vpop.permute.xlu0 %2419 }
 0x17a   : > { %v3372_v63 = vpop.permute.xlu1 %2429  ;;  %2504 = vrot.lane.b32.xlu0 %v2503_v62, %s2979_s25 }
 0x17c   : > { %v671_v1 = vpop.permute.xlu0 %670 }
 0x17d   : > { %v680_v7 = vsel %vm678_vm3, %v661_v39, %v671_v1  ;;  %v685_v48 = vsel %vm678_vm3, %v671_v1, %v661_v39  ;;  %v2528_v39 = vpack.i.bf16 %v522_v27, %v520_v22 }
 0x17e   : > { %v3382_v13 = vmul.f32 %v3265_v46, %v685_v48  ;;  %v705_v16 = vmul.f32 %v3267_v47, %v680_v7  ;;  %v663_v23 = vpop.permute.xlu1 %662 }
 0x180   : > { %4457 = vst [vmem:[#allocation12_spill] sm:$0xff] %v3382_v13  ;;  %v1146_v28 = vpop.permute.xlu0 %1145  ;;  %v3388_v29 = vpack.i.bf16 %v3382_v13, %v3276_v52  ;;  %v3391_v4 = vpack.i.bf16 %v705_v16, %v3279_v53 }
 0x182   : > { %v1156_v30 = vpop.permute.xlu1 %1155  ;;  %2514 = vrot.lane.b32.xlu0 %v3388_v29, %s2979_s25  ;;  %2519 = vrot.lane.b32.xlu1 %v3391_v4, %s2979_s25 }
 0x183   : > { %v1164_v1 = vsel %vm1161_vm2, %v1146_v28, %v1156_v30  ;;  %v1169_v3 = vsel %vm1161_vm2, %v1156_v30, %v1146_v28 }
 0x184   : > { %v967_v34 = vpop.permute.xlu0 %966  ;;  %v3417_v48 = vmul.f32 %v3249_v36, %v1164_v1 }
 0x186   : > { %v673_v41 = vpop.permute.xlu1 %672  ;;  %2524 = vrot.lane.b32.xlu0 %v2523_v35, %s2981_s14  ;;  %2529 = vrot.lane.b32.xlu1 %v2528_v39, %s2981_s14 }
 0x187   : > { %v686_v53 = vsel %vm678_vm3, %v673_v41, %v663_v23  ;;  %v681_v0 = vsel %vm678_vm3, %v663_v23, %v673_v41 }
 0x188   : > { %v3404_v49 = vmul.f32 %v3265_v46, %v686_v53  ;;  %v479_v51 = vpop.permute.xlu0 %478  ;;  %v3420_v53 = vmul.f32 %v3251_v37, %v1169_v3  ;;  %v3429_v30 = vmul.f32 %v3267_v47, %v681_v0 }
 0x18a   : > { %4458 = vst [vmem:[#allocation13_spill] sm:$0xff] %v3404_v49  ;;  %v3410_v7 = vpop.permute.xlu1 %2439  ;;  %2539 = vrot.lane.b32.xlu0 %v2528_v39, %s2982_s15  ;;  %2534 = vrot.lane.b32.xlu1 %v2523_v35, %s2982_s15  ;;  %v2553_v39 = vpack.i.bf16 %v3417_v48, %v3327_v32  ;;  %v2558_v1 = vpack.i.bf16 %v3420_v53, %v3330_v33 }
 0x18b   : > { %v2563_v3 = vpack.i.bf16 %v3404_v49, %v3382_v13  ;;  %v2568_v33 = vpack.i.bf16 %v3429_v30, %v705_v16 }
 0x18c   : > { %v3424_v57 = vpop.permute.xlu0 %2434 }
 0x18e   : > { %v969_v28 = vpop.permute.xlu1 %968  ;;  %2549 = vrot.lane.b32.xlu0 %v2508_v50, %s2983_s17  ;;  %2544 = vrot.lane.b32.xlu1 %v2503_v62, %s2983_s17 }
 0x190   : > { %v977_v35 = vpop.permute.xlu0 %976 }
 0x191   : > { %v985_v23 = vsel %vm982_vm4, %v967_v34, %v977_v35  ;;  %v990_v41 = vsel %vm982_vm4, %v977_v35, %v967_v34 }
 0x192   : > { %v3440_v50 = vmul.f32 %v3290_v59, %v985_v23  ;;  %v1011_v62 = vmul.f32 %v3292_v60, %v990_v41  ;;  %v481_v0 = vpop.permute.xlu1 %480  ;;  %2554 = vrot.lane.b32.xlu0 %v2553_v39, %s2979_s25  ;;  %2559 = vrot.lane.b32.xlu1 %v2558_v1, %s2979_s25 }
 0x194   : > { %4459 = vst [vmem:[#allocation14_spill] sm:$0xff] %v3440_v50  ;;  %v489_v45 = vpop.permute.xlu0 %488  ;;  %v3449_v22 = vpack.i.bf16 %v1011_v62, %v3337_v38  ;;  %v3453_v34 = vpack.i.bf16 %v3440_v50, %v3355_v43 }
 0x195   : > { %v499_v35 = vsel %vm496_vm5, %v479_v51, %v489_v45  ;;  %v504_v23 = vsel %vm496_vm5, %v489_v45, %v479_v51 }
 0x196   : > { %v3462_v12 = vmul.f32 %v3306_v5, %v504_v23  ;;  %v524_v16 = vmul.f32 %v3308_v6, %v499_v35  ;;  %v979_v38 = vpop.permute.xlu1 %978  ;;  %2564 = vrot.lane.b32.xlu0 %v2563_v3, %s2981_s14  ;;  %2569 = vrot.lane.b32.xlu1 %v2568_v33, %s2981_s14 }
 0x197   : > { %v986_v41 = vsel %vm982_vm4, %v969_v28, %v979_v38 }
 0x198   : > { %4460 = vst [vmem:[#allocation15_spill] sm:$0xff] %v3462_v12  ;;  %v665_v20 = vpop.permute.xlu0 %664  ;;  %v2573_v21 = vpack.i.bf16 %v3462_v12, %v3358_v55  ;;  %v2578_v52 = vpack.i.bf16 %v524_v16, %v522_v27  ;;  %v991_v55 = vsel %vm982_vm4, %v979_v38, %v969_v28  ;;  %v3494_v28 = vmul.f32 %v3290_v59, %v986_v41 }
 0x199   : > { %v1013_v38 = vmul.f32 %v3292_v60, %v991_v55 }
 0x19a   : > { %v491_v42 = vpop.permute.xlu1 %490  ;;  %2574 = vrot.lane.b32.xlu0 %v2573_v21, %s2979_s25  ;;  %2579 = vrot.lane.b32.xlu1 %v2578_v52, %s2979_s25  ;;  %4461 = vst [vmem:[#allocation16_spill] sm:$0xff] %v3494_v28 }
 0x19b   : > { %v505_v45 = vsel %vm496_vm5, %v491_v42, %v481_v0  ;;  %v500_v27 = vsel %vm496_vm5, %v481_v0, %v491_v42 }
 0x19c   : > { %v3474_v51 = vmul.f32 %v3306_v5, %v505_v45  ;;  %v3476_v35 = vpop.permute.xlu0 %1147 }
 0x19e   : > { %v2450_v23 = vpop.permute.xlu1 %2449  ;;  %2589 = vrot.lane.b32.xlu0 %v2568_v33, %s2982_s15  ;;  %2584 = vrot.lane.b32.xlu1 %v2563_v3, %s2982_s15 }
 0x19f   : > { %v2452_v32 = vunpack.i.h.bf16 %v2450_v23  ;;  %v2451_v45 = vunpack.i.l.bf16 %v2450_v23 }
 0x1a0   : > { %v2445_v43 = vpop.permute.xlu0 %2444 }
 0x1a1   : > { %v2447_v13 = vunpack.i.h.bf16 %v2445_v43  ;;  %v2446_v8 = vunpack.i.l.bf16 %v2445_v43 }
 0x1a2   : > { %v667_v11 = vpop.permute.xlu1 %666  ;;  %2599 = vrot.lane.b32.xlu0 %v2578_v52, %s2983_s17  ;;  %2594 = vrot.lane.b32.xlu1 %v2573_v21, %s2983_s17  ;;  %v2613_v21 = vpack.i.bf16 %v3494_v28, %v3440_v50 }
 0x1a3   : > { %v894_v3 = vsel %vm585_vm6, %v2446_v8, %v2451_v45  ;;  %v895_v33 = vsel %vm585_vm6, %v2447_v13, %v2452_v32  ;;  %v2618_v32 = vpack.i.bf16 %v1013_v38, %v1011_v62  ;;  %v3506_v13 = vmul.f32 %v3308_v6, %v500_v27 }
 0x1a4   : > { %v675_v23 = vpop.permute.xlu0 %674  ;;  %v1496_v43 = vpack.c.bf16 %v895_v33, %v894_v3 }
 0x1a5   : > { %v682_v55 = vsel %vm678_vm3, %v665_v20, %v675_v23  ;;  %v687_v42 = vsel %vm678_vm3, %v675_v23, %v665_v20  ;;  %v2623_v20 = vpack.i.bf16 %v3474_v51, %v3462_v12  ;;  %v2628_v33 = vpack.i.bf16 %v3506_v13, %v524_v16 }
 0x1a6   : > { %2252 = vmatprep.subr.bf16.mxu0 %v1496_v43  ;;  %v3499_v52 = vpop.permute.xlu1 %1149  ;;  %2609 = vrot.lane.b32.xlu0 %v2558_v1, %s2983_s17  ;;  %v3521_v62 = vmul.f32 %v3265_v46, %v687_v42  ;;  %v709_v41 = vmul.f32 %v3267_v47, %v682_v55 }
 0x1a7   : > { %2604 = vrot.lane.b32.xlu1 %v2553_v39, %s2983_s17 }
 0x1a8   : > { %v1158_v8 = vpop.permute.xlu0 %1157 }
 0x1a9   : > { %v1165_v1 = vsel %vm1161_vm2, %v3476_v35, %v1158_v8 }
 0x1aa   : > { %v3516_v39 = vmul.f32 %v3249_v36, %v1165_v1  ;;  %2614 = vrot.lane.b32.xlu0 %v2613_v21, %s2979_s25  ;;  %v981_v0 = vpop.permute.xlu1 %980 }
 0x1ab   : > { %2619 = vrot.lane.b32.xlu1 %v2618_v32, %s2979_s25 }
 0x1ac   : > { %v971_v27 = vpop.permute.xlu0 %970 }
 0x1ad   : > { %v987_v45 = vsel %vm982_vm4, %v971_v27, %v981_v0  ;;  %v992_v3 = vsel %vm982_vm4, %v981_v0, %v971_v27 }
 0x1ae   : > { %v3534_v43 = vmul.f32 %v3290_v59, %v987_v45  ;;  %v1015_v55 = vmul.f32 %v3292_v60, %v992_v3  ;;  %2624 = vrot.lane.b32.xlu0 %v2623_v20, %s2981_s14  ;;  %v677_v42 = vpop.permute.xlu1 %676  ;;  %v3549_v60 = vpack.i.bf16 %v3521_v62, %v3404_v49  ;;  %v3552_v45 = vpack.i.bf16 %v709_v41, %v3429_v30 }
 0x1af   : > { %2629 = vrot.lane.b32.xlu1 %v2628_v33, %s2981_s14  ;;  %v683_v1 = vsel %vm678_vm3, %v667_v11, %v677_v42  ;;  %v688_v0 = vsel %vm678_vm3, %v677_v42, %v667_v11 }
 0x1b0   : > { %v3544_v16 = vmul.f32 %v3265_v46, %v688_v0  ;;  %v711_v27 = vmul.f32 %v3267_v47, %v683_v1  ;;  %v483_v59 = vpop.permute.xlu0 %482  ;;  %v3554_v3 = vpack.i.bf16 %v1015_v55, %v1013_v38  ;;  %v3558_v23 = vpack.i.bf16 %v3534_v43, %v3494_v28 }
 0x1b1   : > { %v1170_v38 = vsel %vm1161_vm2, %v1158_v8, %v3476_v35  ;;  %v2663_v8 = vpack.i.bf16 %v3516_v39, %v3417_v48 }
 0x1b2   : > { %2634 = vrot.lane.b32.xlu0 %v3549_v60, %s2979_s25  ;;  %v493_v11 = vpop.permute.xlu1 %492  ;;  %v3565_v46 = vpack.i.bf16 %v711_v27, %v3544_v16  ;;  %v1192_v0 = vmul.f32 %v3251_v37, %v1170_v38 }
 0x1b3   : > { %2639 = vrot.lane.b32.xlu1 %v3552_v45, %s2979_s25 }
 0x1b4   : > { %v2455_v42 = vpop.permute.xlu0 %2454 }
 0x1b5   : > { %v2457_v12 = vunpack.i.h.bf16 %v2455_v42  ;;  %v2456_v47 = vunpack.i.l.bf16 %v2455_v42 }
 0x1b6   : > { %2649 = vrot.lane.b32.xlu0 %v2628_v33, %s2982_s15  ;;  %v1160_v1 = vpop.permute.xlu1 %1159  ;;  %v2668_v33 = vpack.i.bf16 %v1192_v0, %v3420_v53 }
 0x1b7   : > { %2644 = vrot.lane.b32.xlu1 %v2623_v20, %s2982_s15 }
 0x1b8   : > { %v2460_v35 = vpop.permute.xlu0 %2459 }
 0x1b9   : > { %v2462_v38 = vunpack.i.h.bf16 %v2460_v35  ;;  %v2461_v42 = vunpack.i.l.bf16 %v2460_v35  ;;  %v2698_v35 = vpack.i.bf16 %v711_v27, %v709_v41 }
 0x1ba   : > { %2659 = vrot.lane.b32.xlu0 %v2618_v32, %s2983_s17  ;;  %v2465_v50 = vpop.permute.xlu1 %2464 }
 0x1bb   : > { %2654 = vrot.lane.b32.xlu1 %v2613_v21, %s2983_s17  ;;  %v2467_v30 = vunpack.i.h.bf16 %v2465_v50  ;;  %v2466_v28 = vunpack.i.l.bf16 %v2465_v50 }
 0x1bd   : > { %v3585_v20 = vsel %vm554_vm7, %v2456_v47, %v2466_v28  ;;  %v3589_v32 = vsel %vm554_vm7, %v2457_v12, %v2467_v30  ;;  %v3609_v30 = vpack.i.bf16 %v1015_v55, %v3534_v43  ;;  %v506_v55 = vsel %vm496_vm5, %v493_v11, %v483_v59 }
 0x1be   : > { %2664 = vrot.lane.b32.xlu0 %v2663_v8, %s2981_s14  ;;  %v2470_v50 = vpop.permute.xlu1 %2469  ;;  %v3628_v27 = vmul.f32 %v3306_v5, %v506_v55  ;;  %v3654_v5 = vld [vmem:[%s4410_s3 + $0x8] sm:$0xff] }
 0x1bf   : > { %2669 = vrot.lane.b32.xlu1 %v2668_v33, %s2981_s14  ;;  %v2472_v53 = vunpack.i.h.bf16 %v2470_v50  ;;  %v2471_v49 = vunpack.i.l.bf16 %v2470_v50  ;;  %v501_v50 = vsel %vm496_vm5, %v483_v59, %v493_v11  ;;  %v1171_v59 = vsel %vm1161_vm2, %v1160_v1, %v3499_v52 }
 0x1c0   : > { %v2718_v11 = vpack.i.bf16 %v3628_v27, %v3474_v51 }
 0x1c1   : > { %v3598_v28 = vsel %vm616_vm8, %v2461_v42, %v2471_v49  ;;  %v3602_v12 = vsel %vm616_vm8, %v2462_v38, %v2472_v53  ;;  %v2688_v49 = vpack.i.bf16 %v3544_v16, %v3521_v62 }
 0x1c2   : > { %4462 = vst [vmem:[#allocation17_spill] sm:$0xff] %v3598_v28  ;;  %4463 = vst [vmem:[#allocation18_spill] sm:$0xff] %v3602_v12  ;;  %2674 = vrot.lane.b32.xlu0 %v2663_v8, %s2982_s15  ;;  %v528_v8 = vmul.f32 %v3308_v6, %v501_v50 }
 0x1c3   : > { %2679 = vrot.lane.b32.xlu1 %v2668_v33, %s2982_s15 }
 0x1c4   : > { %v3625_v41 = vpack.i.bf16 %v528_v8, %v3506_v13  ;;  %v2708_v6 = vpack.i.bf16 %v528_v8, %v3628_v27  ;;  %v3659_v13 = vld [vmem:[%s4410_s3 + $0x28] sm:$0xff] }
 0x1c6   : > { %2684 = vrot.lane.b32.xlu0 %v3609_v30, %s2979_s25 }
 0x1c7   : > { %2699 = vrot.lane.b32.xlu1 %v2698_v35, %s2981_s14 }
 0x1ca   : > { %2689 = vrot.lane.b32.xlu0 %v2688_v49, %s2981_s14 }
 0x1cb   : > { %2704 = vrot.lane.b32.xlu1 %v3150_v17, %s2983_s17  ;;  %v1166_v17 = vsel %vm1161_vm2, %v3499_v52, %v1160_v1 }
 0x1cc   : > { %v3662_v52 = vmul.f32 %v3249_v36, %v1166_v17  ;;  %v4431_v36 = vmov 0  }
 0x1cd   : > { %2908 = vset.pattern.permute.xlu0 %v4431_v36  ;;  %2909 = vset.pattern.permute.xlu1 %v4431_v36 }
 0x1ce   : > { %2694 = vrot.lane.b32.xlu0 %v3146_v15, %s2983_s17  ;;  %v3645_v15 = vmul.f32 %v3251_v37, %v1171_v59  ;;  %v3664_v37 = vpop.permute.xlu1 %2474  ;;  %v3683_v42 = vpack.i.bf16 %v3662_v52, %v3516_v39 }
 0x1cf   : > { %2724 = vrot.lane.b32.xlu1 %v3625_v41, %s2979_s25 }
 0x1d0   : > { %v3671_v1 = vpack.i.bf16 %v3645_v15, %v1192_v0 }
 0x1d2   : > { %2709 = vrot.lane.b32.xlu0 %v2708_v6, %s2981_s14 }
 0x1d3   : > { %2739 = vrot.lane.b32.xlu1 %v3340_v40, %s2981_s14 }
 0x1d4   : > { %v3679_v38 = vpop.permute.xlu1 %2479 }
 0x1d6   : > { %2714 = vrot.lane.b32.xlu0 %v3565_v46, %s2979_s25 }
 0x1d7   : > { %2749 = vrot.lane.b32.xlu1 %v3340_v40, %s2982_s15  ;;  %v2190_v40 = vcombine.high %v3654_v5, %v3659_v13 }
 0x1d9   : > { %1764 = vmatprep.mubr.bf16.mxu0 %v2190_v40 }
 0x1da   : > { %2719 = vrot.lane.b32.xlu0 %v2718_v11, %s2979_s25 }
 0x1db   : > { %2754 = vrot.lane.b32.xlu1 %v3671_v1, %s2979_s25 }
 0x1de   : > { %2729 = vrot.lane.b32.xlu0 %v3683_v42, %s2979_s25  ;;  %s2176_s25 = sshll.u32 %s346_s23, 2 }
 0x1df   : > { %2759 = vrot.lane.b32.xlu1 %v3131_v10, %s2983_s17 }
 0x1e0   : > { %v2485_v0 = vpop.permute.xlu0 %2484  ;;  %v2500_v53 = vpop.permute.xlu1 %2499 }
 0x1e1   : > { %v2487_v50 = vunpack.i.h.bf16 %v2485_v0  ;;  %v2486_v8 = vunpack.i.l.bf16 %v2485_v0  ;;  %v2502_v55 = vunpack.i.h.bf16 %v2500_v53  ;;  %v2501_v59 = vunpack.i.l.bf16 %v2500_v53 }
 0x1e2   : > { %2734 = vrot.lane.b32.xlu0 %v3346_v44, %s2981_s14 }
 0x1e3   : > { %v3694_v17 = vsel %vm616_vm8, %v2501_v59, %v2502_v55  ;;  %2764 = vrot.lane.b32.xlu1 %v2688_v49, %s2982_s15  ;;  %v3699_v40 = vsel %vm554_vm7, %v2486_v8, %v2487_v50 }
 0x1e4   : > { %4464 = vst [vmem:[#allocation19_spill] sm:$0xff] %v3694_v17  ;;  %v2490_v10 = vpop.permute.xlu0 %2489 }
 0x1e5   : > { %v2492_v0 = vunpack.i.h.bf16 %v2490_v10  ;;  %v2491_v33 = vunpack.i.l.bf16 %v2490_v10 }
 0x1e6   : > { %2744 = vrot.lane.b32.xlu0 %v3346_v44, %s2982_s15  ;;  %v2510_v55 = vpop.permute.xlu1 %2509 }
 0x1e7   : > { %v3708_v53 = vsel %vm647_vm9, %v2491_v33, %v2492_v0  ;;  %2779 = vrot.lane.b32.xlu1 %v3552_v45, %s2983_s17  ;;  %v2512_v10 = vunpack.i.h.bf16 %v2510_v55  ;;  %v2511_v33 = vunpack.i.l.bf16 %v2510_v55  ;;  %v3724_v45 = vld [vmem:[%s4410_s3] sm:$0xff] }
 0x1e8   : > { %v2495_v49 = vpop.permute.xlu0 %2494 }
 0x1e9   : > { %v2497_v50 = vunpack.i.h.bf16 %v2495_v49  ;;  %v2496_v8 = vunpack.i.l.bf16 %v2495_v49 }
 0x1ea   : > { %2769 = vrot.lane.b32.xlu0 %v2698_v35, %s2982_s15  ;;  %v3729_v35 = vld [vmem:[%s4410_s3 + $0x20] sm:$0xff] }
 0x1eb   : > { %2789 = vrot.lane.b32.xlu1 %v3449_v22, %s2981_s14  ;;  %v3717_v59 = vsel %vm616_vm8, %v2496_v8, %v2497_v50  ;;  %v1472_v8 = vpack.c.bf16 %v3303_v2, %v3214_v25 }
 0x1ec   : > { %v2505_v44 = vpop.permute.xlu0 %2504 }
 0x1ed   : > { %v2507_v0 = vunpack.i.h.bf16 %v2505_v44  ;;  %v2506_v36 = vunpack.i.l.bf16 %v2505_v44 }
 0x1ee   : > { %2774 = vrot.lane.b32.xlu0 %v3549_v60, %s2983_s17  ;;  %v2188_v60 = vcombine.high %v3724_v45, %v3729_v35 }
 0x1ef   : > { %2799 = vrot.lane.b32.xlu1 %v2708_v6, %s2982_s15  ;;  %v3734_v49 = vsel %vm554_vm7, %v2506_v36, %v2511_v33  ;;  %v3738_v50 = vsel %vm554_vm7, %v2507_v0, %v2512_v10 }
 0x1f0   : > { %1708 = vmatprep.mubr.bf16.mxu1 %v2188_v60 }
 0x1f2   : > { %2784 = vrot.lane.b32.xlu0 %v3453_v34, %s2981_s14 }
 0x1f3   : > { %2804 = vrot.lane.b32.xlu1 %v3609_v30, %s2983_s17 }
 0x1f4   : > { %v2515_v6 = vpop.permute.xlu0 %2514  ;;  %v2520_v36 = vpop.permute.xlu1 %2519 }
 0x1f5   : > { %v2517_v44 = vunpack.i.h.bf16 %v2515_v6  ;;  %v2516_v10 = vunpack.i.l.bf16 %v2515_v6  ;;  %v2522_v33 = vunpack.i.h.bf16 %v2520_v36  ;;  %v2521_v0 = vunpack.i.l.bf16 %v2520_v36 }
 0x1f6   : > { %2794 = vrot.lane.b32.xlu0 %v3453_v34, %s2982_s15 }
 0x1f7   : > { %2809 = vrot.lane.b32.xlu1 %v2718_v11, %s2983_s17  ;;  %v737_v60 = vsel %vm554_vm7, %v2516_v10, %v2521_v0  ;;  %v738_v55 = vsel %vm554_vm7, %v2517_v44, %v2522_v33 }
 0x1f8   : > { %v2525_v47 = vpop.permute.xlu0 %2524  ;;  %v2530_v21 = vpop.permute.xlu1 %2529  ;;  %v1480_v30 = vpack.c.bf16 %v738_v55, %v737_v60 }
 0x1f9   : > { %v2527_v6 = vunpack.i.h.bf16 %v2525_v47  ;;  %v2526_v28 = vunpack.i.l.bf16 %v2525_v47  ;;  %v2532_v36 = vunpack.i.h.bf16 %v2530_v21  ;;  %v2531_v12 = vunpack.i.l.bf16 %v2530_v21 }
 0x1fa   : > { %2814 = vrot.lane.b32.xlu0 %v3625_v41, %s2983_s17  ;;  %2218 = vmatprep.subr.bf16.mxu1 %v1480_v30  ;;  %v2833_v21 = vpack.i.bf16 %v3645_v15, %v3662_v52  ;;  %v1530_v15 = vld [vmem:[%s4411_s4 + $0x10] sm:$0xff] }
 0x1fb   : > { %2819 = vrot.lane.b32.xlu1 %v3683_v42, %s2983_s17  ;;  %2219 = vmatpush3.bf16.msra.mxu1 %v1472_v8  ;;  %v3765_v34 = vsel %vm585_vm6, %v2526_v28, %v2531_v12  ;;  %v3769_v11 = vsel %vm585_vm6, %v2527_v6, %v2532_v36  ;;  %v2426_v36 = vunpack.i.l.bf16 %v3363_v58 }
 0x1fc   : > { %v2540_v2 = vpop.permute.xlu0 %2539  ;;  %v2535_v47 = vpop.permute.xlu1 %2534 }
 0x1fd   : > { %v2542_v55 = vunpack.i.h.bf16 %v2540_v2  ;;  %v2541_v44 = vunpack.i.l.bf16 %v2540_v2  ;;  %v2537_v42 = vunpack.i.h.bf16 %v2535_v47  ;;  %v2536_v8 = vunpack.i.l.bf16 %v2535_v47 }
 0x1fe   : > { %2824 = vrot.lane.b32.xlu0 %v3671_v1, %s2983_s17  ;;  %v2427_v1 = vunpack.i.h.bf16 %v3363_v58 }
 0x1ff   : > { %v3779_v28 = vsel %vm647_vm9, %v2537_v42, %v2542_v55  ;;  %v3783_v12 = vsel %vm647_vm9, %v2536_v8, %v2541_v44  ;;  %2834 = vrot.lane.b32.xlu1 %v2833_v21, %s2982_s15  ;;  %v2417_v55 = vunpack.i.h.bf16 %v3360_v56  ;;  %v2416_v44 = vunpack.i.l.bf16 %v3360_v56 }
 0x200   : > { %4465 = vst [vmem:[#allocation20_spill] sm:$0xff] %v3783_v12  ;;  %v2550_v10 = vpop.permute.xlu0 %2549  ;;  %v2545_v33 = vpop.permute.xlu1 %2544 }
 0x201   : > { %v2552_v0 = vunpack.i.h.bf16 %v2550_v10  ;;  %v2551_v60 = vunpack.i.l.bf16 %v2550_v10  ;;  %v2547_v30 = vunpack.i.h.bf16 %v2545_v33  ;;  %v2546_v6 = vunpack.i.l.bf16 %v2545_v33 }
 0x202   : > { %2829 = vrot.lane.b32.xlu0 %v2833_v21, %s2981_s14 }
 0x203   : > { %2839 = vrot.lane.b32.xlu1 %v3449_v22, %s2982_s15  ;;  %v3795_v2 = vsel %vm616_vm8, %v2546_v6, %v2551_v60  ;;  %v3799_v47 = vsel %vm616_vm8, %v2547_v30, %v2552_v0  ;;  %v892_v0 = vsel %vm585_vm6, %v2416_v44, %v2426_v36  ;;  %v893_v60 = vsel %vm585_vm6, %v2417_v55, %v2427_v1 }
 0x204   : > { %4466 = vst [vmem:[#allocation21_spill] sm:$0xff] %v3795_v2  ;;  %4467 = vst [vmem:[#allocation22_spill] sm:$0xff] %v3799_v47  ;;  %v2555_v42 = vpop.permute.xlu0 %2554  ;;  %v2560_v8 = vpop.permute.xlu1 %2559 }
 0x205   : > { %v2557_v21 = vunpack.i.h.bf16 %v2555_v42  ;;  %v2556_v10 = vunpack.i.l.bf16 %v2555_v42  ;;  %v2562_v22 = vunpack.i.h.bf16 %v2560_v8  ;;  %v2561_v33 = vunpack.i.l.bf16 %v2560_v8 }
 0x206   : > { %2844 = vrot.lane.b32.xlu0 %v3388_v29, %s2983_s17  ;;  %v1495_v8 = vpack.c.bf16 %v893_v60, %v892_v0 }
 0x207   : > { %2849 = vrot.lane.b32.xlu1 %v3391_v4, %s2983_s17  ;;  %v1221_v56 = vsel %vm554_vm7, %v2556_v10, %v2561_v33  ;;  %v1222_v30 = vsel %vm554_vm7, %v2557_v21, %v2562_v22 }
 0x208   : > { %v3817_v6 = vpop.permute.xlu0 %2564  ;;  %v3819_v42 = vpop.permute.xlu1 %2569  ;;  %v1488_v29 = vpack.c.bf16 %v1222_v30, %v1221_v56 }
 0x20a   : > { %2854 = vrot.lane.b32.xlu0 %v3565_v46, %s2983_s17  ;;  %2253 = vmatpush3.bf16.msra.mxu0 %v1488_v29 }
 0x20b   : > { %2864 = vrot.lane.b32.xlu1 %v3554_v3, %s2981_s14  ;;  %2254 = vmatprep.subr.bf16.mxu0 %v1495_v8 }
 0x20c   : > { %v2575_v4 = vpop.permute.xlu0 %2574  ;;  %v2580_v1 = vpop.permute.xlu1 %2579 }
 0x20d   : > { %v2577_v36 = vunpack.i.h.bf16 %v2575_v4  ;;  %v2576_v55 = vunpack.i.l.bf16 %v2575_v4  ;;  %v2582_v44 = vunpack.i.h.bf16 %v2580_v1  ;;  %v2581_v21 = vunpack.i.l.bf16 %v2580_v1 }
 0x20e   : > { %2859 = vrot.lane.b32.xlu0 %v3558_v23, %s2981_s14 }
 0x20f   : > { %2879 = vrot.lane.b32.xlu1 %v3554_v3, %s2982_s15  ;;  %v3831_v46 = vsel %vm554_vm7, %v2576_v55, %v2581_v21  ;;  %v3835_v10 = vsel %vm554_vm7, %v2577_v36, %v2582_v44  ;;  %v2873_v55 = vpack.i.bf16 %v3222_v26, %v3214_v25 }
 0x210   : > { %v2590_v22 = vpop.permute.xlu0 %2589  ;;  %v2585_v33 = vpop.permute.xlu1 %2584 }
 0x211   : > { %v2592_v60 = vunpack.i.h.bf16 %v2590_v22  ;;  %v2591_v56 = vunpack.i.l.bf16 %v2590_v22  ;;  %v2587_v30 = vunpack.i.h.bf16 %v2585_v33  ;;  %v2586_v29 = vunpack.i.l.bf16 %v2585_v33 }
 0x212   : > { %2869 = vrot.lane.b32.xlu0 %v3558_v23, %s2982_s15 }
 0x213   : > { %v3843_v3 = vsel %vm647_vm9, %v2587_v30, %v2592_v60  ;;  %v3847_v8 = vsel %vm647_vm9, %v2586_v29, %v2591_v56  ;;  %2884 = vrot.lane.b32.xlu1 %v3311_v9, %s2981_s14 }
 0x214   : > { %v2600_v1 = vpop.permute.xlu0 %2599  ;;  %v2595_v36 = vpop.permute.xlu1 %2594 }
 0x215   : > { %v2602_v23 = vunpack.i.h.bf16 %v2600_v1  ;;  %v2601_v44 = vunpack.i.l.bf16 %v2600_v1  ;;  %v2597_v21 = vunpack.i.h.bf16 %v2595_v36  ;;  %v2596_v22 = vunpack.i.l.bf16 %v2595_v36 }
 0x216   : > { %2874 = vrot.lane.b32.xlu0 %v2873_v55, %s2981_s14  ;;  %s2339_s14 = smul.u32 40, %s319_s26  ;;  %s348_s26 = scalar_lea.vmem %s4415_s8, %s2176_s25 }
 0x217   : > { %v3858_v33 = vsel %vm616_vm8, %v2597_v21, %v2602_v23  ;;  %v3862_v60 = vsel %vm616_vm8, %v2596_v22, %v2601_v44  ;;  %2894 = vrot.lane.b32.xlu1 %v3311_v9, %s2982_s15  ;;  %v1531_v21 = vld [vmem:[%s4411_s4 + $0x18] sm:$0xff] }
 0x218   : > { %4468 = vst [vmem:[#allocation23_spill] sm:$0xff] %v3858_v33  ;;  %4469 = vst [vmem:[#allocation24_spill] sm:$0xff] %v3862_v60  ;;  %v2610_v26 = vpop.permute.xlu0 %2609  ;;  %s4353_s27 = scalar_lea.vmem [#allocation3], %s2339_s14  ;;  %s2215_s14 = sshll.u32 (%p3077_p5), %s2003_s22, 3 }
 0x219   : > { %v2612_v56 = vunpack.i.h.bf16 %v2610_v26  ;;  %v2611_v30 = vunpack.i.l.bf16 %v2610_v26  ;;  %v2605_v29 = vpop.permute.xlu1 %2604  ;;  %s2005_s16 = scalar_lea.vmem (%p3077_p5), %s4414_s7, %s2215_s14 }
 0x21a   : > { %v2607_v1 = vunpack.i.h.bf16 %v2605_v29  ;;  %v2606_v36 = vunpack.i.l.bf16 %v2605_v29  ;;  %2889 = vrot.lane.b32.xlu0 %v2873_v55, %s2982_s15 }
 0x21b   : > { %2904 = vrot.lane.b32.xlu1 %v3208_v24, %s2982_s15 }
 0x21c   : > { %v3873_v23 = vsel %vm616_vm8, %v2607_v1, %v2612_v56  ;;  %v3877_v9 = vsel %vm616_vm8, %v2606_v36, %v2611_v30  ;;  %v3879_v44 = vpop.permute.xlu0 %2614 }
 0x21d   : > { %4470 = vst [vmem:[#allocation25_spill] sm:$0xff] %v3873_v23  ;;  %4471 = vst [vmem:[#allocation26_spill] sm:$0xff] %v3877_v9  ;;  %v3883_v22 = vpop.permute.xlu1 %2619 }
 0x21e   : > { %2899 = vrot.lane.b32.xlu0 %v3158_v19, %s2982_s15  ;;  %v1532_v19 = vld [vmem:[%s4411_s4 + $0x20] sm:$0xff] }
 0x21f   : > { %1550 = vperm.xlu1 %2909, %v1531_v21   ;;  %v1529_v21 = vld [vmem:[%s4411_s4 + $0x8] sm:$0xff] }
 0x220   : > { %v3887_v55 = vpop.permute.xlu0 %2624 }
 0x221   : > { %v3889_v24 = vpop.permute.xlu1 %2629 }
 0x222   : > { %1555 = vperm.xlu0 %2908, %v1532_v19  }
 0x223   : > { %1545 = vperm.xlu1 %2909, %v1530_v15  }
 0x224   : > { %v3891_v26 = vpop.permute.xlu0 %2634 }
 0x225   : > { %v3893_v56 = vpop.permute.xlu1 %2639 }
 0x226   : > { %1540 = vperm.xlu0 %2908, %v1529_v21  }
 0x228   : > { %v2650_v30 = vpop.permute.xlu0 %2649 }
 0x229   : > { %v2652_v29 = vunpack.i.h.bf16 %v2650_v30  ;;  %v2651_v1 = vunpack.i.l.bf16 %v2650_v30  ;;  %v2645_v36 = vpop.permute.xlu1 %2644 }
 0x22a   : > { %v2647_v58 = vunpack.i.h.bf16 %v2645_v36  ;;  %v2646_v25 = vunpack.i.l.bf16 %v2645_v36 }
 0x22c   : > { %v3906_v30 = vsel %vm647_vm9, %v2647_v58, %v2652_v29  ;;  %v3910_v4 = vsel %vm647_vm9, %v2646_v25, %v2651_v1  ;;  %v2660_v0 = vpop.permute.xlu0 %2659  ;;  %v1528_v58 = vld [vmem:[%s4411_s4] sm:$0xff] }
 0x22d   : > { %v2662_v41 = vunpack.i.h.bf16 %v2660_v0  ;;  %v2661_v9 = vunpack.i.l.bf16 %v2660_v0  ;;  %v2655_v23 = vpop.permute.xlu1 %2654  ;;  %v1906_v0 = vld [vmem:[%s4413_s6] sm:$0x7]  ;;  %1535 = vperm.xlu1 %2909, %v1528_v58  }
 0x22e   : > { %v2657_v19 = vunpack.i.h.bf16 %v2655_v23  ;;  %v2656_v17 = vunpack.i.l.bf16 %v2655_v23  ;;  %1909 = vperm.xlu0 %2908, %v1906_v0  }
 0x230   : > { %v2665_v25 = vpop.permute.xlu0 %2664  ;;  %v3922_v29 = vsel %vm616_vm8, %v2656_v17, %v2661_v9  ;;  %v3926_v1 = vsel %vm616_vm8, %v2657_v19, %v2662_v41  ;;  %v2477_v17 = vunpack.i.h.bf16 %v3664_v37  ;;  %v2476_v9 = vunpack.i.l.bf16 %v3664_v37 }
 0x231   : > { %4472 = vst [vmem:[#allocation27_spill] sm:$0xff] %v3922_v29  ;;  %4473 = vst [vmem:[#allocation28_spill] sm:$0xff] %v3926_v1  ;;  %v2667_v23 = vunpack.i.h.bf16 %v2665_v25  ;;  %v2666_v15 = vunpack.i.l.bf16 %v2665_v25  ;;  %v2670_v36 = vpop.permute.xlu1 %2669 }
 0x232   : > { %v2672_v21 = vunpack.i.h.bf16 %v2670_v36  ;;  %v2671_v47 = vunpack.i.l.bf16 %v2670_v36 }
 0x234   : > { %v3937_v41 = vsel %vm585_vm6, %v2667_v23, %v2672_v21  ;;  %v3941_v19 = vsel %vm585_vm6, %v2666_v15, %v2671_v47  ;;  %v2675_v25 = vpop.permute.xlu0 %2674  ;;  %v1220_v47 = vsel %vm554_vm7, %v2476_v9, %v2477_v17  ;;  %v2567_v15 = vunpack.i.h.bf16 %v3817_v6 }
 0x235   : > { %4474 = vst [vmem:[#allocation29_spill] sm:$0xff] %v3937_v41  ;;  %4475 = vst [vmem:[#allocation30_spill] sm:$0xff] %v3941_v19  ;;  %v2677_v60 = vunpack.i.h.bf16 %v2675_v25  ;;  %v2676_v36 = vunpack.i.l.bf16 %v2675_v25  ;;  %v2680_v58 = vpop.permute.xlu1 %2679  ;;  %v2617_v41 = vunpack.i.h.bf16 %v3879_v44  ;;  %v2572_v17 = vunpack.i.h.bf16 %v3819_v42 }
 0x236   : > { %v2682_v0 = vunpack.i.h.bf16 %v2680_v58  ;;  %v2681_v33 = vunpack.i.l.bf16 %v2680_v58  ;;  %v2571_v9 = vunpack.i.l.bf16 %v3819_v42 }
 0x238   : > { %v3947_v37 = vsel %vm647_vm9, %v2677_v60, %v2682_v0  ;;  %v3951_v23 = vsel %vm647_vm9, %v2676_v36, %v2681_v33  ;;  %v2685_v21 = vpop.permute.xlu0 %2684  ;;  %v2616_v60 = vunpack.i.l.bf16 %v3879_v44  ;;  %v2622_v0 = vunpack.i.h.bf16 %v3883_v22 }
 0x239   : > { %4476 = vst [vmem:[#allocation31_spill] sm:$0xff] %v3947_v37  ;;  %4477 = vst [vmem:[#allocation32_spill] sm:$0xff] %v3951_v23  ;;  %v2687_v2 = vunpack.i.h.bf16 %v2685_v21  ;;  %v2686_v19 = vunpack.i.l.bf16 %v2685_v21  ;;  %v2700_v58 = vpop.permute.xlu1 %2699  ;;  %v2621_v33 = vunpack.i.l.bf16 %v3883_v22  ;;  %v2566_v36 = vunpack.i.l.bf16 %v3817_v6 }
 0x23a   : > { %v2702_v37 = vunpack.i.h.bf16 %v2700_v58  ;;  %v2701_v29 = vunpack.i.l.bf16 %v2700_v58  ;;  %v1044_v6 = vsel %vm554_vm7, %v2617_v41, %v2622_v0  ;;  %v2481_v41 = vunpack.i.l.bf16 %v3679_v38 }
 0x23b   : > { %v1045_v25 = vsel %vm554_vm7, %v2686_v19, %v2687_v2  ;;  %v1043_v22 = vsel %vm554_vm7, %v2616_v60, %v2621_v33  ;;  %v768_v19 = vsel %vm585_vm6, %v2566_v36, %v2571_v9  ;;  %v2482_v33 = vunpack.i.h.bf16 %v3679_v38 }
 0x23c   : > { %v2690_v23 = vpop.permute.xlu0 %2689  ;;  %v1487_v21 = vpack.c.bf16 %v1220_v47, %v1045_v25  ;;  %v1486_v60 = vpack.c.bf16 %v1044_v6, %v1043_v22  ;;  %v2631_v0 = vunpack.i.l.bf16 %v3889_v24  ;;  %v2437_v36 = vunpack.i.h.bf16 %v3424_v57 }
 0x23d   : > { %v2692_v1 = vunpack.i.h.bf16 %v2690_v23  ;;  %v2691_v12 = vunpack.i.l.bf16 %v2690_v23  ;;  %v3967_v44 = vpop.permute.xlu1 %2704  ;;  %v769_v23 = vsel %vm585_vm6, %v2567_v15, %v2572_v17  ;;  %v2436_v17 = vunpack.i.l.bf16 %v3424_v57 }
 0x23e   : > { %2255 = vmatpush3.bf16.msra.mxu0 %v1487_v21  ;;  %v2442_v22 = vunpack.i.h.bf16 %v3410_v7  ;;  %v2441_v6 = vunpack.i.l.bf16 %v3410_v7 }
 0x23f   : > { %v770_v42 = vsel %vm585_vm6, %v2691_v12, %v2701_v29  ;;  %v771_v2 = vsel %vm585_vm6, %v2692_v1, %v2702_v37  ;;  %v1493_v12 = vpack.c.bf16 %v769_v23, %v768_v19  ;;  %v2627_v29 = vunpack.i.h.bf16 %v3887_v55 }
 0x240   : > { %v3981_v47 = vpop.permute.xlu0 %2694  ;;  %v1494_v25 = vpack.c.bf16 %v771_v2, %v770_v42  ;;  %v2626_v1 = vunpack.i.l.bf16 %v3887_v55  ;;  %v2632_v37 = vunpack.i.h.bf16 %v3889_v24  ;;  %v4478_v55 = vpack.c.bf16 %v3738_v50, %v3734_v49 }
 0x241   : > { %v2725_v58 = vpop.permute.xlu1 %2724  ;;  %v767_v42 = vsel %vm585_vm6, %v2481_v41, %v2482_v33  ;;  %v863_v49 = vsel %vm554_vm7, %v2436_v17, %v2441_v6  ;;  %v864_v50 = vsel %vm554_vm7, %v2437_v36, %v2442_v22  ;;  %v2412_v41 = vunpack.i.h.bf16 %v3281_v54 }
 0x242   : > { %2256 = vmatprep.subr.bf16.mxu0 %v1494_v25  ;;  %v588_v57 = vsel %vm585_vm6, %v2626_v1, %v2631_v0  ;;  %v589_v2 = vsel %vm585_vm6, %v2627_v29, %v2632_v37  ;;  %v4479_v29 = vpack.c.bf16 %v3589_v32, %v3585_v20  ;;  %v2727_v1 = vunpack.i.h.bf16 %v2725_v58 }
 0x243   : > { %2257 = vmatpush3.bf16.msra.mxu0 %v1486_v60  ;;  %v1491_v33 = vpack.c.bf16 %v589_v2, %v588_v57  ;;  %v1483_v0 = vpack.c.bf16 %v864_v50, %v863_v49  ;;  %v2637_v22 = vunpack.i.h.bf16 %v3891_v26  ;;  %v2636_v6 = vunpack.i.l.bf16 %v3891_v26 }
 0x244   : > { %v2710_v15 = vpop.permute.xlu0 %2709  ;;  %2258 = vmatprep.subr.bf16.mxu0 %v1493_v12  ;;  %v2411_v12 = vunpack.i.l.bf16 %v3281_v54  ;;  %v2642_v54 = vunpack.i.h.bf16 %v3893_v56  ;;  %v2641_v20 = vunpack.i.l.bf16 %v3893_v56  ;;  %v2431_v49 = vunpack.i.l.bf16 %v3372_v63 }
 0x245   : > { %v2712_v9 = vunpack.i.h.bf16 %v2710_v15  ;;  %v2711_v21 = vunpack.i.l.bf16 %v2710_v15  ;;  %v3991_v38 = vpop.permute.xlu1 %2739  ;;  %v2726_v15 = vunpack.i.l.bf16 %v2725_v58 }
 0x246   : > { %v739_v50 = vsel %vm554_vm7, %v2636_v6, %v2641_v20 }
 0x247   : > { %2259 = vmatpush3.bf16.msra.mxu0 %v4478_v55  ;;  %v590_v24 = vsel %vm585_vm6, %v2711_v21, %v2712_v9  ;;  %v862_v55 = vsel %vm554_vm7, %v2411_v12, %v2412_v41  ;;  %v2421_v12 = vunpack.i.l.bf16 %v3368_v61 }
 0x248   : > { %v2715_v19 = vpop.permute.xlu0 %2714  ;;  %v1492_v23 = vpack.c.bf16 %v767_v42, %v590_v24  ;;  %v4480_v42 = vpack.c.bf16 %v3769_v11, %v3765_v34  ;;  %v740_v34 = vsel %vm554_vm7, %v2637_v22, %v2642_v54  ;;  %v4481_v11 = vpack.c.bf16 %v3152_v18, %v3140_v14 }
 0x249   : > { %v2717_v25 = vunpack.i.h.bf16 %v2715_v19  ;;  %v2716_v7 = vunpack.i.l.bf16 %v2715_v19  ;;  %v4006_v60 = vpop.permute.xlu1 %2749  ;;  %v1481_v18 = vpack.c.bf16 %v740_v34, %v739_v50  ;;  %v4487_v22 = vmov 0   ;;  %v4497_v34 = vld [vmem:[#allocation7_spill] sm:$0xff] }
 0x24a   : > { %2260 = vmatprep.subr.bf16.mxu0 %v1492_v23 }
 0x24b   : > { %2261 = vmatpush3.bf16.msra.mxu0 %v4479_v29  ;;  %v741_v36 = vsel %vm554_vm7, %v2716_v7, %v2717_v25  ;;  %v2432_v7 = vunpack.i.h.bf16 %v3372_v63  ;;  %v2422_v63 = vunpack.i.h.bf16 %v3368_v61  ;;  %v1329_v61 = vld [vmem:[%s4410_s3 + $0x48] sm:$0xff] }
 0x24c   : > { %v2720_v37 = vpop.permute.xlu0 %2719  ;;  %2262 = vmatprep.subr.bf16.mxu0 %v1491_v33  ;;  %v1482_v57 = vpack.c.bf16 %v862_v55, %v741_v36  ;;  %v4486_v36 = vpack.c.bf16 %v3699_v40, %v3662_v52  ;;  %v4490_v52 = vpack.c.bf16 %v3516_v39, %v3417_v48  ;;  %v4491_v39 = vld [vmem:[#allocation13_spill] sm:$0xff] }
 0x24d   : > { %v2722_v9 = vunpack.i.h.bf16 %v2720_v37  ;;  %v2721_v17 = vunpack.i.l.bf16 %v2720_v37  ;;  %v2755_v21 = vpop.permute.xlu1 %2754 }
 0x24e   : > { %v2757_v2 = vunpack.i.h.bf16 %v2755_v21  ;;  %v2756_v19 = vunpack.i.l.bf16 %v2755_v21 }
 0x24f   : > { %2263 = vmatpush3.bf16.msra.mxu0 %v1483_v0  ;;  %v558_v32 = vsel %vm554_vm7, %v2721_v17, %v2726_v15  ;;  %v559_v58 = vsel %vm554_vm7, %v2722_v9, %v2727_v1  ;;  %v4482_v1 = vpack.c.bf16 %v3835_v10, %v3831_v46  ;;  %v953_v0 = vsel %vm647_vm9, %v2422_v63, %v2432_v7  ;;  %v1333_v9 = vld [vmem:[%s4410_s3 + $0x68] sm:$0xff]  ;;  %v4483_v46 = vld [vmem:[#allocation5_spill] sm:$0xff]  ;;  %v4484_v10 = vld [vmem:[#allocation4_spill] sm:$0xff] }
 0x250   : > { %v2730_v24 = vpop.permute.xlu0 %2729  ;;  %2264 = vmatprep.subr.bf16.mxu0 %v4480_v42  ;;  %v1479_v26 = vpack.c.bf16 %v559_v58, %v558_v32  ;;  %v952_v15 = vsel %vm647_vm9, %v2421_v12, %v2431_v49  ;;  %v4485_v17 = vpack.c.bf16 %v4483_v46, %v4484_v10  ;;  %v2198_v20 = vcombine.high %v1329_v61, %v1333_v9 }
 0x251   : > { %v2732_v56 = vunpack.i.h.bf16 %v2730_v24  ;;  %v2731_v23 = vunpack.i.l.bf16 %v2730_v24  ;;  %v4032_v25 = vpop.permute.xlu1 %2759  ;;  %v1520_v54 = vpack.c.bf16 %v953_v0, %v952_v15  ;;  %v4488_v32 = vcombine.low %v3654_v5, %v3659_v13  ;;  %v4492_v5 = vld [vmem:[#allocation12_spill] sm:$0xff] }
 0x252   : > { %2220 = vmatprep.subr.bf16.mxu1 %v1479_v26  ;;  %v4489_v58 = vpack.c.bf16 %v3544_v16, %v3521_v62  ;;  %v1337_v62 = vld [vmem:[%s4410_s3 + $0x88] sm:$0xff]  ;;  %v4493_v13 = vpack.c.bf16 %v4491_v39, %v4492_v5  ;;  %v2197_v49 = vcombine.low %v1329_v61, %v1333_v9  ;;  %v4500_v61 = vpack.c.bf16 %v3843_v3, %v3847_v8  ;;  %v4119_v9 = vld [vmem:[%s4410_s3 + $0x18] sm:$0xff]  ;;  %v4503_v3 = vld [vmem:[#allocation14_spill] sm:$0xff] }
 0x253   : > { %2221 = vmatpush3.bf16.msra.mxu1 %v4481_v11  ;;  %2265 = vmatpush3.bf16.msra.mxu0 %v1482_v57  ;;  %v1223_v33 = vsel %vm554_vm7, %v2731_v23, %v2756_v19  ;;  %v1224_v41 = vsel %vm554_vm7, %v2732_v56, %v2757_v2  ;;  %v4494_v56 = vld [vmem:[#allocation9_spill] sm:$0xff]  ;;  %v4495_v23 = vld [vmem:[#allocation6_spill] sm:$0xff]  ;;  %v1467_v11 = vpack.c.bf16 %v4497_v34, %v3628_v27 }
 0x254   : > { %v4049_v29 = vpop.permute.xlu0 %2734  ;;  %2222 = vmatprep.subr.bf16.mxu1 %v4482_v1  ;;  %v1489_v37 = vpack.c.bf16 %v1224_v41, %v1223_v33  ;;  %v4496_v7 = vpack.c.bf16 %v4494_v56, %v4495_v23  ;;  %v2206_v33 = vcombine.high %v1337_v62, %v1337_v62  ;;  %v4504_v8 = vld [vmem:[#allocation10_spill] sm:$0xff]  ;;  %v4509_v5 = vcombine.low %v3724_v45, %v3729_v35 }
 0x255   : > { %v2765_v14 = vpop.permute.xlu1 %2764 }
 0x256   : > { %2266 = vmatprep.subr.bf16.mxu0 %v1489_v37  ;;  %v2767_v40 = vunpack.i.h.bf16 %v2765_v14  ;;  %v2766_v24 = vunpack.i.l.bf16 %v2765_v14  ;;  %v4498_v37 = vld [vmem:[#allocation16_spill] sm:$0xff] }
 0x257   : > { %2223 = vmatpush3.bf16.msra.mxu1 %v4485_v17  ;;  %2267 = vmatpush3.bf16.msra.mxu0 %v1481_v18  ;;  %v4499_v14 = vpack.c.bf16 %v3534_v43, %v4498_v37  ;;  %v4124_v43 = vld [vmem:[%s4410_s3 + $0x38] sm:$0xff]  ;;  %v4505_v17 = vpack.c.bf16 %v4503_v3, %v4504_v8 }
 0x258   : > { %v4067_v21 = vpop.permute.xlu0 %2744  ;;  %2224 = vmatprep.subr.bf16.mxu1 %v4486_v36  ;;  %1844 = vmatprep.subr.bf16.mxu0 %v4487_v22 }
 0x259   : > { %v4073_v6 = vpop.permute.xlu1 %2779 }
 0x25a   : > { %1765 = vmatmul.mubr.bf16.vlgmr.msra.gmra.mxu0 %v4488_v32 }
 0x25b   : > { %2225 = vmatpush3.bf16.msra.mxu1 %v4489_v58  ;;  %1845 = vmatpush1.bf16.msra.mxu0 %v1520_v54  ;;  %v4140_v54 = vld [vmem:[%s4410_s3 + $0x40] sm:$0xff] }
 0x25c   : > { %v2770_v55 = vpop.permute.xlu0 %2769  ;;  %2226 = vmatprep.subr.bf16.mxu1 %v4490_v52  ;;  %1846 = vmatprep.subr.bf16.mxu0 %v4487_v22  ;;  %v4506_v52 = vld [vmem:[#allocation11_spill] sm:$0xff] }
 0x25d   : > { %v2772_v42 = vunpack.i.h.bf16 %v2770_v55  ;;  %v2771_v26 = vunpack.i.l.bf16 %v2770_v55  ;;  %v4085_v57 = vpop.permute.xlu1 %2789  ;;  %1772 = vmatprep.mubr.bf16.mxu0 %v2198_v20  ;;  %v2205_v20 = vcombine.low %v1337_v62, %v1337_v62  ;;  %v2194_v55 = vcombine.high %v4119_v9, %v4124_v43 }
 0x25f   : > { %v830_v16 = vsel %vm647_vm9, %v2766_v24, %v2771_v26  ;;  %v831_v48 = vsel %vm647_vm9, %v2767_v40, %v2772_v42  ;;  %2227 = vmatpush3.bf16.msra.mxu1 %v4493_v13  ;;  %v4507_v40 = vld [vmem:[#allocation8_spill] sm:$0xff]  ;;  %v4510_v13 = vpack.c.bf16 %v3906_v30, %v3910_v4  ;;  %v2696_v4 = vunpack.i.l.bf16 %v3981_v47 }
 0x260   : > { %v1519_v2 = vpack.c.bf16 %v831_v48, %v830_v16  ;;  %v4097_v19 = vpop.permute.xlu0 %2774  ;;  %2228 = vmatprep.subr.bf16.mxu1 %v4496_v7  ;;  %v4508_v24 = vpack.c.bf16 %v4506_v52, %v4507_v40  ;;  %v2737_v52 = vunpack.i.h.bf16 %v4049_v29  ;;  %v2736_v40 = vunpack.i.l.bf16 %v4049_v29  ;;  %v4223_v29 = vld [vmem:[%s4410_s3 + $0x10] sm:$0xff] }
 0x261   : > { %v2800_v50 = vpop.permute.xlu1 %2799 }
 0x262   : > { %v2802_v41 = vunpack.i.h.bf16 %v2800_v50  ;;  %v2801_v63 = vunpack.i.l.bf16 %v2800_v50  ;;  %1847 = vmatpush1.bf16.msra.mxu0 %v1519_v2 }
 0x263   : > { %2229 = vmatpush3.bf16.msra.mxu1 %v1467_v11  ;;  %1848 = vmatprep.subr.bf16.mxu0 %v4487_v22  ;;  %v2697_v11 = vunpack.i.h.bf16 %v3981_v47  ;;  %v4514_v47 = vld [vmem:[#allocation27_spill] sm:$0xff] }
 0x264   : > { %v652_v12 = vsel %vm647_vm9, %v2801_v63, %v2802_v41  ;;  %v4107_v1 = vpop.permute.xlu0 %2784  ;;  %2230 = vmatprep.subr.bf16.mxu1 %v4499_v14  ;;  %1773 = vmatmul.mubr.bf16.gmra.mxu0 %v2197_v49  ;;  %v4511_v41 = vld [vmem:[#allocation20_spill] sm:$0xff] }
 0x265   : > { %v1517_v18 = vpack.c.bf16 %v3708_v53, %v652_v12  ;;  %v2805_v27 = vpop.permute.xlu1 %2804  ;;  %1780 = vmatprep.mubr.bf16.mxu0 %v2206_v33  ;;  %v4501_v53 = vld [vmem:[#allocation15_spill] sm:$0xff]  ;;  %v4512_v63 = vpack.c.bf16 %v3779_v28, %v4511_v41  ;;  %v4176_v12 = vld [vmem:[%s4410_s3 + $0x80] sm:$0xff]  ;;  %v2707_v28 = vunpack.i.h.bf16 %v3967_v44  ;;  %v4527_v41 = vld [vmem:[#allocation17_spill] sm:$0xff] }
 0x266   : > { %v2807_v0 = vunpack.i.h.bf16 %v2805_v27  ;;  %v2806_v15 = vunpack.i.l.bf16 %v2805_v27  ;;  %1849 = vmatpush1.bf16.msra.mxu0 %v4500_v61  ;;  %v4502_v46 = vpack.c.bf16 %v3474_v51, %v4501_v53  ;;  %v4145_v51 = vld [vmem:[%s4410_s3 + $0x60] sm:$0xff] }
 0x267   : > { %1850 = vmatprep.subr.bf16.mxu0 %v4487_v22  ;;  %v2196_v42 = vcombine.high %v4140_v54, %v4145_v51  ;;  %v2195_v53 = vcombine.low %v4140_v54, %v4145_v51  ;;  %v924_v51 = vsel %vm616_vm8, %v2697_v11, %v2707_v28  ;;  %v4523_v11 = vld [vmem:[#allocation25_spill] sm:$0xff] }
 0x268   : > { %2231 = vmatpush3.bf16.msra.mxu1 %v4502_v46  ;;  %v4130_v10 = vpop.permute.xlu0 %2794  ;;  %v1105_v36 = vsel %vm616_vm8, %v2806_v15, %v2807_v0  ;;  %v2706_v0 = vunpack.i.l.bf16 %v3967_v44 }
 0x269   : > { %2232 = vmatprep.subr.bf16.mxu1 %v4505_v17  ;;  %v2810_v32 = vpop.permute.xlu1 %2809  ;;  %v1512_v58 = vpack.c.bf16 %v3717_v59, %v1105_v36  ;;  %v2204_v17 = vcombine.high %v4176_v12, %v4176_v12  ;;  %v2203_v36 = vcombine.low %v4176_v12, %v4176_v12 }
 0x26a   : > { %1851 = vmatpush1.bf16.msra.mxu0 %v1517_v18  ;;  %v2812_v62 = vunpack.i.h.bf16 %v2810_v32  ;;  %v2811_v16 = vunpack.i.l.bf16 %v2810_v32  ;;  %v4513_v18 = vld [vmem:[#allocation28_spill] sm:$0xff]  ;;  %v923_v54 = vsel %vm616_vm8, %v2696_v4, %v2706_v0  ;;  %v4524_v4 = vld [vmem:[#allocation26_spill] sm:$0xff] }
 0x26b   : > { %1852 = vmatprep.subr.bf16.mxu0 %v4487_v22  ;;  %v4515_v27 = vpack.c.bf16 %v4513_v18, %v4514_v47  ;;  %v4517_v32 = vld [vmem:[#allocation24_spill] sm:$0xff]  ;;  %v1508_v18 = vpack.c.bf16 %v924_v51, %v923_v54  ;;  %v2791_v54 = vunpack.i.l.bf16 %v4085_v57  ;;  %v2787_v51 = vunpack.i.h.bf16 %v4107_v1 }
 0x26c   : > { %2233 = vmatpush3.bf16.msra.mxu1 %v4508_v24  ;;  %v2815_v26 = vpop.permute.xlu0 %2814  ;;  %1781 = vmatmul.mubr.bf16.gmra.mxu0 %v2205_v20  ;;  %v4516_v20 = vld [vmem:[#allocation23_spill] sm:$0xff] }
 0x26d   : > { %2286 = vmatprep.subr.bf16.mxu1 %v1512_v58  ;;  %v2817_v59 = vunpack.i.h.bf16 %v2815_v26  ;;  %v2816_v48 = vunpack.i.l.bf16 %v2815_v26  ;;  %v2820_v39 = vpop.permute.xlu1 %2819  ;;  %2211 = vmatprep.mubr.msk.bf16.mxu0 %vm1663_vm10, %v2194_v55  ;;  %v4518_v58 = vpack.c.bf16 %v4516_v20, %v4517_v32  ;;  %v2742_v55 = vunpack.i.h.bf16 %v3991_v38  ;;  %v4520_v26 = vld [vmem:[#allocation21_spill] sm:$0xff] }
 0x26e   : > { %1853 = vmatpush1.bf16.msra.mxu0 %v4510_v13  ;;  %v2822_v49 = vunpack.i.h.bf16 %v2820_v39  ;;  %v2821_v50 = vunpack.i.l.bf16 %v2820_v39  ;;  %v4522_v39 = vld [vmem:[#allocation19_spill] sm:$0xff]  ;;  %v2792_v32 = vunpack.i.h.bf16 %v4085_v57 }
 0x26f   : > { %1709 = vmatmul.mubr.bf16.vlgmr.msra.gmra.mxu1 %v4509_v5  ;;  %v620_v2 = vsel %vm616_vm8, %v2811_v16, %v2816_v48  ;;  %v621_v56 = vsel %vm616_vm8, %v2812_v62, %v2817_v59  ;;  %1854 = vmatprep.subr.bf16.mxu0 %v4487_v22  ;;  %v2747_v16 = vunpack.i.h.bf16 %v4067_v21  ;;  %v2746_v59 = vunpack.i.l.bf16 %v4067_v21 }
 0x270   : > { %1716 = vmatprep.mubr.bf16.mxu1 %v2196_v42  ;;  %v1504_v23 = vpack.c.bf16 %v621_v56, %v620_v2  ;;  %v2825_v7 = vpop.permute.xlu0 %2824  ;;  %v4519_v42 = vld [vmem:[#allocation22_spill] sm:$0xff]  ;;  %v2776_v48 = vunpack.i.l.bf16 %v4097_v19  ;;  %v4228_v2 = vld [vmem:[%s4410_s3 + $0x30] sm:$0xff]  ;;  %v2741_v56 = vunpack.i.l.bf16 %v3991_v38  ;;  %v2752_v21 = vunpack.i.h.bf16 %v4006_v60 }
 0x271   : > { %v2827_v34 = vunpack.i.h.bf16 %v2825_v7  ;;  %v2826_v45 = vunpack.i.l.bf16 %v2825_v7  ;;  %v2835_v35 = vpop.permute.xlu1 %2834  ;;  %v4521_v62 = vpack.c.bf16 %v4519_v42, %v4520_v26  ;;  %v4525_v38 = vpack.c.bf16 %v4523_v11, %v4524_v4 }
 0x272   : > { %v2837_v30 = vunpack.i.h.bf16 %v2835_v35  ;;  %v2836_v33 = vunpack.i.l.bf16 %v2835_v35  ;;  %2287 = vmatpush3.bf16.msra.mxu1 %v1504_v23  ;;  %1855 = vmatpush1.bf16.msra.mxu0 %v4512_v63  ;;  %v2777_v23 = vunpack.i.h.bf16 %v4097_v19  ;;  %v2781_v35 = vunpack.i.l.bf16 %v4073_v6 }
 0x273   : > { %v1283_v37 = vsel %vm616_vm8, %v2821_v50, %v2826_v45  ;;  %v1284_v14 = vsel %vm616_vm8, %v2822_v49, %v2827_v34  ;;  %2288 = vmatprep.subr.bf16.mxu1 %v4515_v27  ;;  %1856 = vmatprep.subr.bf16.mxu0 %v4487_v22  ;;  %v2751_v50 = vunpack.i.l.bf16 %v4006_v60  ;;  %v2762_v34 = vunpack.i.h.bf16 %v4032_v25  ;;  %v4526_v60 = vld [vmem:[#allocation18_spill] sm:$0xff] }
 0x274   : > { %v1514_v15 = vpack.c.bf16 %v1284_v14, %v1283_v37  ;;  %v2830_v61 = vpop.permute.xlu0 %2829  ;;  %v1314_v44 = vsel %vm647_vm9, %v2836_v33, %v2837_v30  ;;  %v2761_v45 = vunpack.i.l.bf16 %v4032_v25  ;;  %v1250_v19 = vsel %vm585_vm6, %v2736_v40, %v2741_v56 }
 0x275   : > { %v2832_v46 = vunpack.i.h.bf16 %v2830_v61  ;;  %v2831_v3 = vunpack.i.l.bf16 %v2830_v61  ;;  %v4190_v8 = vpop.permute.xlu1 %2839  ;;  %v1527_v49 = vpack.c.bf16 %v1314_v44, %v1314_v44  ;;  %v1251_v30 = vsel %vm585_vm6, %v2737_v52, %v2742_v55 }
 0x276   : > { %2289 = vmatpush3.bf16.msra.mxu1 %v4518_v58  ;;  %1857 = vmatpush1.bf16.msra.mxu0 %v1514_v15  ;;  %v2782_v33 = vunpack.i.h.bf16 %v4073_v6  ;;  %v4528_v63 = vpack.c.bf16 %v4526_v60, %v4527_v41  ;;  %v2192_v25 = vcombine.high %v4223_v29, %v4228_v2  ;;  %v1310_v12 = vsel %vm647_vm9, %v2746_v59, %v2751_v50 }
 0x277   : > { %v1254_v24 = vsel %vm585_vm6, %v2831_v3, %v2832_v46  ;;  %2290 = vmatprep.subr.bf16.mxu1 %v4521_v62  ;;  %1858 = vmatprep.subr.bf16.mxu0 %v4487_v22  ;;  %v1311_v37 = vsel %vm647_vm9, %v2747_v16, %v2752_v21  ;;  %v799_v6 = vsel %vm616_vm8, %v2776_v48, %v2781_v35  ;;  %v1674_v0 = vsel %vm374_vm0, %v1527_v49, 0  ;;  %v4530_v46 = vld [vmem:[#allocation30_spill] sm:$0xff] }
 0x278   : > { %v1502_v5 = vpack.c.bf16 %v4522_v39, %v1254_v24  ;;  %v4218_v13 = vpop.permute.xlu0 %2844  ;;  %1717 = vmatmul.mubr.bf16.gmra.mxu1 %v2195_v53  ;;  %v800_v15 = vsel %vm616_vm8, %v2777_v23, %v2782_v33  ;;  %v1500_v61 = vpack.c.bf16 %v1251_v30, %v1250_v19  ;;  %v4529_v53 = vld [vmem:[#allocation29_spill] sm:$0xff]  ;;  %v1525_v20 = vpack.c.bf16 %v1311_v37, %v1310_v12 }
 0x279   : > { %v4233_v7 = vpop.permute.xlu1 %2849  ;;  %1724 = vmatprep.mubr.bf16.mxu1 %v2204_v17  ;;  %v4531_v3 = vpack.c.bf16 %v4529_v53, %v4530_v46  ;;  %v922_v17 = vsel %vm616_vm8, %v2761_v45, %v2762_v34  ;;  %v2786_v58 = vunpack.i.l.bf16 %v4107_v1  ;;  %v1506_v40 = vpack.c.bf16 %v800_v15, %v799_v6  ;;  %v4532_v1 = vld [vmem:[#allocation31_spill] sm:$0xff]  ;;  %v1330_v46 = vld [vmem:[%s4410_s3 + $0x50] sm:$0xff] }
 0x27a   : > { %2291 = vmatpush3.bf16.msra.mxu1 %v1502_v5  ;;  %1859 = vmatpush1.bf16.msra.mxu0 %v4525_v38  ;;  %v2847_v59 = vunpack.i.h.bf16 %v4218_v13  ;;  %v2846_v48 = vunpack.i.l.bf16 %v4218_v13  ;;  %v2852_v39 = vunpack.i.h.bf16 %v4233_v7  ;;  %v2851_v57 = vunpack.i.l.bf16 %v4233_v7  ;;  %v4533_v5 = vld [vmem:[#allocation32_spill] sm:$0xff] }
 0x27b   : > { %2292 = vmatprep.subr.bf16.mxu1 %v4528_v63  ;;  %1862 = vmatprep.subr.bf16.mxu0 %v4487_v22  ;;  %v4534_v56 = vpack.c.bf16 %v4532_v1, %v4533_v5  ;;  %v1073_v13 = vsel %vm585_vm6, %v2787_v51, %v2792_v32  ;;  %v2842_v7 = vunpack.i.h.bf16 %v4190_v8  ;;  %v2841_v49 = vunpack.i.l.bf16 %v4190_v8  ;;  %v1335_v1 = vld [vmem:[%s4410_s3 + $0x78] sm:$0xff] }
 0x27c   : > { %v2855_v14 = vpop.permute.xlu0 %2854  ;;  %v2797_v19 = vunpack.i.h.bf16 %v4130_v10  ;;  %v2796_v30 = vunpack.i.l.bf16 %v4130_v10  ;;  %v797_v33 = vsel %vm616_vm8, %v2846_v48, %v2851_v57  ;;  %v798_v60 = vsel %vm616_vm8, %v2847_v59, %v2852_v39  ;;  %v1338_v39 = vld [vmem:[%s4410_s3 + $0x90] sm:$0xff]  ;;  %v1331_v57 = vld [vmem:[%s4410_s3 + $0x58] sm:$0xff] }
 0x27d   : > { %v2857_v47 = vunpack.i.h.bf16 %v2855_v14  ;;  %v2856_v27 = vunpack.i.l.bf16 %v2855_v14  ;;  %v2865_v28 = vpop.permute.xlu1 %2864 }
 0x27e   : > { %2293 = vmatpush3.bf16.msra.mxu1 %v4531_v3  ;;  %1863 = vmatpush2.bf16.msra.mxu0 %v1674_v0  ;;  %v2867_v24 = vunpack.i.h.bf16 %v2865_v28  ;;  %v2866_v42 = vunpack.i.l.bf16 %v2865_v28  ;;  %v1133_v12 = vsel %vm647_vm9, %v2797_v19, %v2842_v7  ;;  %v1505_v28 = vpack.c.bf16 %v798_v60, %v797_v33  ;;  %v1334_v3 = vld [vmem:[%s4410_s3 + $0x70] sm:$0xff] }
 0x27f   : > { %2294 = vmatprep.subr.bf16.mxu1 %v1508_v18  ;;  %1864 = vmatprep.subr.bf16.mxu0 %v4487_v22  ;;  %v801_v44 = vsel %vm616_vm8, %v2856_v27, %v2857_v47  ;;  %v1132_v18 = vsel %vm647_vm9, %v2796_v30, %v2841_v49  ;;  %v2199_v31 = vcombine.low %v1330_v46, %v1334_v3 }
 0x280   : > { %v2860_v55 = vpop.permute.xlu0 %2859  ;;  %v1507_v52 = vpack.c.bf16 %v922_v17, %v801_v44  ;;  %1725 = vmatmul.mubr.bf16.gmra.mxu1 %v2203_v36  ;;  %v1072_v36 = vsel %vm585_vm6, %v2786_v58, %v2791_v54  ;;  %v1523_v17 = vpack.c.bf16 %v1133_v12, %v1132_v18  ;;  %v2191_v54 = vcombine.low %v4223_v29, %v4228_v2 }
 0x281   : > { %v2862_v26 = vunpack.i.h.bf16 %v2860_v55  ;;  %v2861_v62 = vunpack.i.l.bf16 %v2860_v55  ;;  %v2880_v16 = vpop.permute.xlu1 %2879  ;;  %1820 = vmatprep.mubr.bf16.mxu1 %v2192_v25  ;;  %v1498_v10 = vpack.c.bf16 %v1073_v13, %v1072_v36  ;;  %v2200_v55 = vcombine.high %v1330_v46, %v1334_v3 }
 0x282   : > { %2295 = vmatpush3.bf16.msra.mxu1 %v1500_v61  ;;  %1865 = vmatpush2.bf16.msra.mxu0 %v4534_v56  ;;  %v2882_v45 = vunpack.i.h.bf16 %v2880_v16  ;;  %v2881_v35 = vunpack.i.l.bf16 %v2880_v16  ;;  %v2193_v56 = vcombine.low %v4119_v9, %v4124_v43  ;;  %v2208_v36 = vcombine.high %v1338_v39, %v1338_v39 }
 0x283   : > { %v1074_v21 = vsel %vm585_vm6, %v2861_v62, %v2866_v42  ;;  %v1075_v23 = vsel %vm585_vm6, %v2862_v26, %v2867_v24  ;;  %2296 = vmatprep.subr.bf16.mxu1 %v1507_v52  ;;  %1866 = vmatprep.subr.bf16.mxu0 %v4487_v22  ;;  %v4535_v24 = vmov 0.0   ;;  %v2201_v13 = vcombine.low %v1331_v57, %v1335_v1 }
 0x284   : > { %v1499_v50 = vpack.c.bf16 %v1075_v23, %v1074_v21  ;;  %v2870_v34 = vpop.permute.xlu0 %2869  ;;  %v1339_v21 = vld [vmem:[%s4410_s3 + $0x98] sm:$0xff]  ;;  %v2207_v23 = vcombine.low %v1338_v39, %v1338_v39 }
 0x285   : > { %v2872_v11 = vunpack.i.h.bf16 %v2870_v34  ;;  %v2871_v4 = vunpack.i.l.bf16 %v2870_v34  ;;  %v2885_v38 = vpop.permute.xlu1 %2884  ;;  %v2210_v7 = vcombine.high %v1339_v21, %v1339_v21  ;;  %v2209_v9 = vcombine.low %v1339_v21, %v1339_v21 }
 0x286   : > { %2297 = vmatpush3.bf16.msra.mxu1 %v1499_v50  ;;  %1867 = vmatpush2.bf16.msra.mxu0 %v1525_v20  ;;  %v2887_v63 = vunpack.i.h.bf16 %v2885_v38  ;;  %v2886_v25 = vunpack.i.l.bf16 %v2885_v38 }
 0x287   : > { %v1134_v8 = vsel %vm647_vm9, %v2871_v4, %v2881_v35  ;;  %v1135_v41 = vsel %vm647_vm9, %v2872_v11, %v2882_v45  ;;  %2298 = vmatprep.subr.bf16.mxu1 %v1506_v40  ;;  %1868 = vmatprep.subr.bf16.mxu0 %v4487_v22 }
 0x288   : > { %v1524_v37 = vpack.c.bf16 %v1135_v41, %v1134_v8  ;;  %v2875_v14 = vpop.permute.xlu0 %2874  ;;  %v1071_v0 = vsel %vm585_vm6, %v2886_v25, %v2887_v63 }
 0x289   : > { %v2877_v6 = vunpack.i.h.bf16 %v2875_v14  ;;  %v2876_v47 = vunpack.i.l.bf16 %v2875_v14  ;;  %v2895_v27 = vpop.permute.xlu1 %2894 }
 0x28a   : > { %2299 = vmatpush3.bf16.msra.mxu1 %v1498_v10  ;;  %1869 = vmatpush2.bf16.msra.mxu0 %v1524_v37  ;;  %v2897_v61 = vunpack.i.h.bf16 %v2895_v27  ;;  %v2896_v53 = vunpack.i.l.bf16 %v2895_v27 }
 0x28b   : > { %v896_v15 = vsel %vm585_vm6, %v2876_v47, %v2877_v6  ;;  %2300 = vmatprep.subr.bf16.mxu1 %v1505_v28  ;;  %1870 = vmatprep.subr.bf16.mxu0 %v4487_v22 }
 0x28c   : > { %v1497_v20 = vpack.c.bf16 %v1071_v0, %v896_v15  ;;  %v2890_v32 = vpop.permute.xlu0 %2889  ;;  %v1131_v52 = vsel %vm647_vm9, %v2896_v53, %v2897_v61 }
 0x28d   : > { %v2892_v58 = vunpack.i.h.bf16 %v2890_v32  ;;  %v2891_v44 = vunpack.i.l.bf16 %v2890_v32  ;;  %v2905_v51 = vpop.permute.xlu1 %2904 }
 0x28e   : > { %2301 = vmatpush3.bf16.msra.mxu1 %v1497_v20  ;;  %1871 = vmatpush2.bf16.msra.mxu0 %v1523_v17  ;;  %v2907_v62 = vunpack.i.h.bf16 %v2905_v51  ;;  %v2906_v16 = vunpack.i.l.bf16 %v2905_v51 }
 0x28f   : > { %v956_v40 = vsel %vm647_vm9, %v2891_v44, %v2892_v58  ;;  %1872 = vmatprep.subr.bf16.mxu0 %v4487_v22  ;;  %2326 = vmatprep.subr.mxu1 %v4535_v24 }
 0x290   : > { %v1522_v42 = vpack.c.bf16 %v1131_v52, %v956_v40  ;;  %v2900_v26 = vpop.permute.xlu0 %2899 }
 0x291   : > { %v2902_v59 = vunpack.i.h.bf16 %v2900_v26  ;;  %v2901_v29 = vunpack.i.l.bf16 %v2900_v26  ;;  %1821 = vmatmul.mubr.bf16.vlgmr.msra.gmra.mxu1 %v2191_v54 }
 0x292   : > { %1873 = vmatpush2.bf16.msra.mxu0 %v1522_v42  ;;  %1828 = vmatprep.mubr.bf16.mxu1 %v2200_v55 }
 0x293   : > { %v954_v2 = vsel %vm647_vm9, %v2901_v29, %v2906_v16  ;;  %v955_v48 = vsel %vm647_vm9, %v2902_v59, %v2907_v62  ;;  %1874 = vmatprep.subr.bf16.mxu0 %v4487_v22  ;;  %v2202_v22 = vcombine.high %v1331_v57, %v1335_v1 }
 0x294   : > { %v1521_v5 = vpack.c.bf16 %v955_v48, %v954_v2 }
 0x296   : > { %1875 = vmatpush2.bf16.msra.mxu0 %v1521_v5 }
 0x299   : > { %1829 = vmatmul.mubr.bf16.gmra.mxu1 %v2199_v31  ;;  %1877 = vmatmul.mubr.bf16.vlgmr.msra.gmra.mxu0 %v2193_v56 }
 0x29a   : > { %1836 = vmatprep.mubr.bf16.mxu1 %v2208_v36  ;;  %2212 = vmatprep.mubr.msk.bf16.mxu0 %vm1663_vm10, %v2202_v22  ;;  %v1551_v6 = vpop.permute.xlu1 %1550 }
 0x29d   : > { %v1556_v0 = vpop.permute.xlu0 %1555 }
 0x29e   : > { %v1546_v28 = vpop.permute.xlu1 %1545 }
 0x2a1   : > { %1837 = vmatmul.mubr.bf16.gmra.mxu1 %v2207_v23  ;;  %1885 = vmatmul.mubr.bf16.gmra.mxu0 %v2201_v13  ;;  %v1541_v17 = vpop.permute.xlu0 %1540 }
 0x2a2   : > { %2213 = vmatprep.mubr.msk.bf16.mxu0 %vm1663_vm10, %v2210_v7  ;;  %2336 = vmatprep.mubr.msk.f32.mxu1 %vm2985_vm11, %v4535_v24 }
 0x2a8   : > { %v1536_v61 = vpop.permute.xlu1 %1535 }
 0x2a9   : > { %1893 = vmatmul.mubr.bf16.gmra.mxu0 %v2209_v9 }
 0x31a   : > { %v2268_v43 = vpop.f32.mrf.mxu0 }
 0x31c   : > { %v2269_v49 = vpop.f32.mrf.mxu0 }
 0x31d   : > { %v2270_v32 = vadd.f32 %v2269_v49, %v2268_v43 }
 0x31e   : > { %v2271_v50 = vpop.f32.mrf.mxu0 }
 0x320   : > { %v2272_v34 = vpop.f32.mrf.mxu0 }
 0x321   : > { %v2273_v40 = vadd.f32 %v2272_v34, %v2271_v50 }
 0x324   : > { %v2274_v45 = vpop.f32.mrf.mxu0 }
 0x326   : > { %v2275_v35 = vpop.f32.mrf.mxu0 }
 0x327   : > { %v2276_v62 = vadd.f32 %v2275_v35, %v2274_v45 }
 0x328   : > { %v2277_v11 = vpop.f32.mrf.mxu0 }
 0x32a   : > { %v2278_v4 = vpop.f32.mrf.mxu0 }
 0x32b   : > { %v2279_v31 = vadd.f32 %v2278_v4, %v2277_v11 }
 0x32c   : > { %v4348_v38 = vpop.f32.mrf.mxu0 }
 0x32e   : > { %v4350_v30 = vpop.f32.mrf.mxu0 }
 0x32f   : > { %v2234_v19 = vpop.f32.mrf.mxu1  ;;  %v2282_v11 = vadd.f32 %v4350_v30, %v4348_v38 }
 0x330   : > { %v2283_v60 = vpop.f32.mrf.mxu0 }
 0x331   : > { %v2235_v33 = vpop.f32.mrf.mxu1 }
 0x332   : > { %v2284_v41 = vpop.f32.mrf.mxu0  ;;  %v2236_v15 = vadd.f32 %v2235_v33, %v2234_v19 }
 0x333   : > { %v2237_v8 = vpop.f32.mrf.mxu1 }
 0x334   : > { %v1711_v46 = vadd.f32 %v2236_v15, %v1536_v61 }
 0x335   : > { %v2238_v63 = vpop.f32.mrf.mxu1 }
 0x336   : > { %v2239_v3 = vadd.f32 %v2238_v63, %v2237_v8  ;;  %v1767_v54 = vadd.f32 %v2270_v32, %v1711_v46 }
 0x338   : > { %v2240_v25 = vpop.f32.mrf.mxu1  ;;  %v1714_v51 = vadd.f32 %v2239_v3, %v1541_v17 }
 0x33a   : > { %v2241_v10 = vpop.f32.mrf.mxu1  ;;  %v1770_v29 = vadd.f32 %v2273_v40, %v1714_v51 }
 0x33b   : > { %v2242_v55 = vadd.f32 %v2241_v10, %v2240_v25 }
 0x33c   : > { %v2243_v12 = vpop.f32.mrf.mxu1 }
 0x33d   : > { %v1719_v2 = vadd.f32 %v2242_v55, %v1546_v28  ;;  %v1905_v28 = vld [vmem:[%s4412_s5] sm:$0x7] }
 0x33e   : > { %v2244_v37 = vpop.f32.mrf.mxu1 }
 0x33f   : > { %v2245_v48 = vadd.f32 %v2244_v37, %v2243_v12  ;;  %v1775_v21 = vadd.f32 %v2276_v62, %v1719_v2 }
 0x340   : > { %v2246_v14 = vpop.f32.mrf.mxu1 }
 0x341   : > { %v1722_v23 = vadd.f32 %v2245_v48, %v1551_v6 }
 0x342   : > { %v2247_v18 = vpop.f32.mrf.mxu1 }
 0x343   : > { %v2248_v13 = vadd.f32 %v2247_v18, %v2246_v14  ;;  %v1778_v35 = vadd.f32 %v2279_v31, %v1722_v23 }
 0x344   : > { %v2249_v47 = vpop.f32.mrf.mxu1 }
 0x345   : > { %v1727_v19 = vadd.f32 %v2248_v13, %v1556_v0  ;;  %v1910_v0 = vpop.permute.xlu0 %1909 }
 0x346   : > { %v2250_v27 = vpop.f32.mrf.mxu1 }
 0x347   : > { %v1783_v10 = vadd.f32 %v2282_v11, %v1727_v19 }
 0x351   : > { %v2302_v53 = vpop.f32.mrf.mxu1 }
 0x353   : > { %v2303_v20 = vpop.f32.mrf.mxu1 }
 0x354   : > { %v2304_v58 = vadd.f32 %v2303_v20, %v2302_v53 }
 0x355   : > { %v2305_v44 = vpop.f32.mrf.mxu1 }
 0x356   : > { %v1823_v26 = vadd.f32 %v2304_v58, %v1767_v54 }
 0x357   : > { %v2306_v52 = vpop.f32.mrf.mxu1 }
 0x358   : > { %v2307_v42 = vadd.f32 %v2306_v52, %v2305_v44 }
 0x359   : > { %v2308_v16 = vpop.f32.mrf.mxu1  ;;  %v1878_v59 = vpop.f32.mrf.mxu0 }
 0x35a   : > { %v1879_v39 = vadd.f32 %v1878_v59, %v1823_v26  ;;  %v1826_v56 = vadd.f32 %v2307_v42, %v1770_v29 }
 0x35b   : > { %v2309_v57 = vpop.f32.mrf.mxu1  ;;  %v1880_v1 = vpop.f32.mrf.mxu0 }
 0x35c   : > { %1900 = vst [vmem:[%s4353_s27] sm:$0xff] %v1879_v39  ;;  %v2310_v5 = vadd.f32 %v2309_v57, %v2308_v16 }
 0x35d   : > { %v2311_v36 = vpop.f32.mrf.mxu1  ;;  %v1881_v22 = vpop.f32.mrf.mxu0 }
 0x35e   : > { %v1882_v7 = vadd.f32 %v1881_v22, %v1826_v56  ;;  %v1831_v50 = vadd.f32 %v2310_v5, %v1775_v21 }
 0x35f   : > { %v2312_v9 = vpop.f32.mrf.mxu1  ;;  %v1883_v43 = vpop.f32.mrf.mxu0 }
 0x360   : > { %1901 = vst [vmem:[%s4353_s27 + $0x8] sm:$0xff] %v1882_v7  ;;  %v2313_v49 = vadd.f32 %v2312_v9, %v2311_v36 }
 0x361   : > { %v2314_v34 = vpop.f32.mrf.mxu1  ;;  %v1886_v45 = vpop.f32.mrf.mxu0 }
 0x362   : > { %v1887_v4 = vadd.f32 %v1886_v45, %v1831_v50  ;;  %v1834_v41 = vadd.f32 %v2313_v49, %v1778_v35 }
 0x363   : > { %v2315_v33 = vpop.f32.mrf.mxu1  ;;  %v1888_v60 = vpop.f32.mrf.mxu0 }
 0x364   : > { %1902 = vst [vmem:[%s4353_s27 + $0x10] sm:$0xff] %v1887_v4  ;;  %v2316_v8 = vadd.f32 %v2315_v33, %v2314_v34 }
 0x365   : > { %v2317_v63 = vpop.f32.mrf.mxu1  ;;  %v1889_v25 = vpop.f32.mrf.mxu0 }
 0x366   : > { %v1890_v12 = vadd.f32 %v1889_v25, %v1834_v41  ;;  %v1839_v18 = vadd.f32 %v2316_v8, %v1783_v10 }
 0x367   : > { %v2318_v37 = vpop.f32.mrf.mxu1  ;;  %v1891_v14 = vpop.f32.mrf.mxu0  ;;  %v2044_v46 = vld [vmem:[%s4353_s27 + $0x8] sm:$0xff] (%p3077_p5) }
 0x368   : > { %1903 = vst [vmem:[%s4353_s27 + $0x18] sm:$0xff] %v1890_v12  ;;  %2045 = vst [vmem:[%s2005_s16 + $0x10] sm:$0xff] (%p3077_p5), %v2044_v46 }
 0x369   : > { %v1894_v6 = vpop.f32.mrf.mxu0 }
 0x36a   : > { %v1895_v47 = vadd.f32 %v1894_v6, %v1839_v18 }
 0x36b   : > { %v1896_v27 = vpop.f32.mrf.mxu0  ;;  %v2046_v3 = vld [vmem:[%s4353_s27 + $0x10] sm:$0xff] (%p3077_p5) }
 0x36c   : > { %1904 = vst [vmem:[%s4353_s27 + $0x20] sm:$0xff] %v1895_v47  ;;  %2327 = vmatpush3.msra.mxu1 %v1895_v47  ;;  %2047 = vst [vmem:[%s2005_s16 + $0x20] sm:$0xff] (%p3077_p5), %v2046_v3 }
 0x36d   : > { %v1897_v38 = vpop.f32.mrf.mxu0  ;;  %2328 = vmatprep.subr.mxu1 %v4535_v24 }
 0x36e   : > { %2329 = vmatpush3.msra.mxu1 %v1890_v12 }
 0x36f   : > { %v1898_v30 = vpop.f32.mrf.mxu0  ;;  %2330 = vmatprep.subr.mxu1 %v4535_v24  ;;  %v2048_v17 = vld [vmem:[%s4353_s27 + $0x18] sm:$0xff] (%p3077_p5) }
 0x370   : > { %2331 = vmatpush3.msra.mxu1 %v1887_v4  ;;  %2049 = vst [vmem:[%s2005_s16 + $0x30] sm:$0xff] (%p3077_p5), %v2048_v17 }
 0x371   : > { %2332 = vmatprep.subr.mxu1 %v4535_v24 }
 0x372   : > { %2333 = vmatpush3.msra.mxu1 %v1882_v7 }
 0x373   : > { %2334 = vmatprep.subr.mxu1 %v4535_v24  ;;  %v2042_v24 = vld [vmem:[%s4353_s27] sm:$0xff] (%p3077_p5) }
 0x374   : > { %2335 = vmatpush3.msra.mxu1 %v1879_v39  ;;  %v2050_v20 = vld [vmem:[%s4353_s27 + $0x20] sm:$0xff] (%p3077_p5)  ;;  %2043 = vst [vmem:[%s2005_s16] sm:$0xff] (%p3077_p5), %v2042_v24 }
 0x375   : > { %2337 = vmatmul.mubr.msk.f32.vlgmr.msra.gmra.mxu1 %vm1912_vm12, %v1905_v28  ;;  %2051 = vst [vmem:[%s2005_s16 + $0x40] sm:$0xff] (%p3077_p5), %v2050_v20 }
 0x434   : > { %2001 = sbr.rel (!%p3077_p5) target bundleno = 1081 (0x439), region = 52 }
 0x435   : > { %v1982_v15 = vpop.f32.mrf.mxu1 }
 0x436   : > { %v1983_v61 = vadd.f32 %v1982_v15, %v1910_v0 }
 0x437   : > { %v2338_v53 = vpop.f32.mrf.mxu1 }
 0x438   : > { %1986 = vst [vmem:[%s348_s26] sm:$0x7] %v1983_v61 }
 0x439 PF: > { %s19_s11 = sadd.s32 1, %s2973_s11   ;;  %s4536_s27 = smov %s2953_s28 }
 0x43a   : > { %p16_p11 = scmp.ge.s32.totalorder %s19_s11, 6   ;;  %s4537_s28 = smov %s3088_s20 }
 0x43b   : > { %s4538_s29 = smov %s2965_s9  ;;  %s4539_s30 = smov %s2969_s10 }
 0x43c   : > { %s4540_s9 = smov %s4543_s12  ;;  %s4541_s10 = smov %s4547_s13 }
 0x43d   :  { %18 = sbr.rel (!%p16_p11) target bundleno = 4 (0x4), region = 131 }

</bundles_post_ra>
